<compile_context>
chip_gen: v7x
topology: tpu7x:2x2x1
jax: 0.10.0
libtpu: 0.0.40
codegen_flags: <defaults>
</compile_context>

<pallas_src>
import numpy as np

import jax
import jax.numpy as jnp
from jax import lax
from jax.experimental import pallas as pl
from jax.experimental.pallas import tpu as pltpu


# Per-layer activations: 3 encoder convs (relu), 1x1 quantize conv (none),
# decoder conv (relu), convT (relu), convT (sigmoid fused from VQVAE.decode).
ACTS = ("relu", "relu", "relu", "none", "relu", "relu", "sigmoid")
N_ENCODER_LAYERS = 4      # layers before the vector quantizer (incl. 1x1 conv)
GF_OUT = 4                # row-group packing of the kernel's input/output layout
DEC_PAD_LANES = 256       # final output lanes padded to a multiple of 128


# --------------------------------------------------------------------------
# Host-side construction of the fused per-layer weight matrix B.
#
# Packed layout: a logical (H, W, C) activation with row-group factor G is
# stored as (R, G*W*C) with R = H/G and
#     packed[r, g*W*C + w*C + c] = logical[G*r + g, w, c].
# Each layer consumes rows_cat = lane-concat of [shift(-1), shift(0), shift(+1)]
# of the (zero row-padded) packed input, so the whole layer is
#     out = act(rows_cat @ B + bias_row).
# --------------------------------------------------------------------------
def _build_conv_B(w, H_in, W_in, Gin, Gout, stride, pad):
    """nn.Conv2d(k, stride, pad) in slab/lane-packed single-matmul form."""
    kh, kw, cin, cout = w.shape
    H_out = (H_in + 2 * pad - kh) // stride + 1
    W_out = (W_in + 2 * pad - kw) // stride + 1
    R = H_in // Gin
    assert H_in % Gin == 0 and H_out == Gout * R and Gin == stride * Gout
    Lin, Lout = Gin * W_in * cin, Gout * W_out * cout
    simple = (kh == 1 and pad == 0 and stride == 1)      # 1x1 conv
    nslab = 1 if simple else 3
    B = np.zeros((nslab * Lin, Lout), np.float32)
    for g_o in range(Gout):
        for i in range(kh):
            d, g_in = divmod(stride * g_o + i - pad, Gin)   # packed-row offset
            assert -1 <= d <= 1
            slab = 0 if simple else d + 1
            for x in range(W_out):
                for j in range(kw):
                    v = stride * x + j - pad
                    if 0 <= v < W_in:
                        r0 = slab * Lin + g_in * W_in * cin + v * cin
                        c0 = g_o * W_out * cout + x * cout
                        B[r0:r0 + cin, c0:c0 + cout] += w[i, j]
    return B, H_out, W_out, (not simple)


def _build_convT_B(w, H_in, W_in, Gin, Gout):
    """nn.ConvTranspose2d(k=4, s=2, p=1) in the same slab/lane-packed form."""
    kh, kw, cin, cout = w.shape
    H_out, W_out = 2 * H_in, 2 * W_in
    R = H_in // Gin
    assert H_in % Gin == 0 and H_out == Gout * R and Gout == 2 * Gin
    Lin, Lout = Gin * W_in * cin, Gout * W_out * cout
    B = np.zeros((3 * Lin, Lout), np.float32)
    for g_o in range(Gout):
        r_par = g_o % 2
        half = (g_o - r_par) // 2
        for dy in range(2):
            ky = 3 - r_par - 2 * dy
            d, g_in = divmod(half + r_par - 1 + dy, Gin)    # packed-row offset
            assert -1 <= d <= 1
            slab = d + 1
            for x in range(W_out):
                for ix in range(W_in):
                    kx = x - 2 * ix + 1
                    if 0 <= kx < kw:
                        r0 = slab * Lin + g_in * W_in * cin + ix * cin
                        c0 = g_o * W_out * cout + x * cout
                        B[r0:r0 + cin, c0:c0 + cout] += w[ky, kx]
    return B, H_out, W_out, True


# --------------------------------------------------------------------------
# Fused VQVAE kernel
# --------------------------------------------------------------------------
def _make_kernel(n_layers, n_enc, acts, needs_nb, Wl, Ke, dec_valid):
    def kernel(*refs):
        x_ref = refs[0]
        lrefs = [(refs[1 + 2 * l], refs[2 + 2 * l]) for l in range(n_layers)]
        cbd_ref = refs[1 + 2 * n_layers]     # (Wl*D, Wl*Ke) block-diag codebook^T
        e2_ref = refs[2 + 2 * n_layers]      # (1, Wl*Ke) tiled ||e_k||^2
        cbp_ref = refs[3 + 2 * n_layers]     # (Wl*Ke, Wl*D) block-diag placement
        dec_ref = refs[4 + 2 * n_layers]     # (R, DEC_PAD_LANES) output slab

        def layer(a, l):
            b_ref, bias_ref = lrefs[l]
            a_bf = a.astype(jnp.bfloat16)
            if needs_nb[l]:
                R, C = a_bf.shape
                zrow = jnp.zeros((1, C), jnp.bfloat16)
                a_pad = jnp.concatenate([zrow, a_bf, zrow], axis=0)     # (R+2, C)
                rows = jnp.concatenate(
                    [a_pad[0:R], a_pad[1:R + 1], a_pad[2:R + 2]], axis=1)  # (R, 3C)
            else:
                rows = a_bf
            out = jnp.dot(rows, b_ref[...], preferred_element_type=jnp.float32)
            out = out + bias_ref[...]
            act = acts[l]
            if act == "relu":
                out = jnp.maximum(out, 0.0)
            elif act == "sigmoid":
                out = jax.nn.sigmoid(out)
            return out                                                  # f32

        # ---- Encoder + 1x1 quantize conv (all VMEM/vreg resident) ----
        h = x_ref[...]                       # (R, G*W*Cin) bf16, packed layout
        for l in range(n_enc):
            h = layer(h, l)
        z = h                                # (Hl, Wl*D) f32 latents (G=1)

        # ---- Vector quantizer: 1 distance matmul + 1 gather matmul ----
        ze = jnp.dot(z, cbd_ref[...], preferred_element_type=jnp.float32)  # (Hl, Wl*Ke)
        dist = e2_ref[...] - 2.0 * ze        # argmin-equivalent distance
        onehots = []
        for xw in range(Wl):                 # static unroll, VPU/XLU only
            db = dist[:, xw * Ke:(xw + 1) * Ke]                 # (Hl, Ke)
            mind = jnp.min(db, axis=1, keepdims=True)
            kio = lax.broadcasted_iota(jnp.int32, db.shape, 1)
            idx = jnp.min(jnp.where(db == mind, kio, Ke),
                          axis=1, keepdims=True)                # first argmin
            onehots.append((kio == idx).astype(jnp.float32))
        onehot = jnp.concatenate(onehots, axis=1)               # (Hl, Wl*Ke)
        quant = jnp.dot(onehot, cbp_ref[...],
                        preferred_element_type=jnp.float32)     # (Hl, Wl*D)

        # commitment MSE partial sum for this batch element
        dsq = quant - z
        dsum = jnp.sum(jnp.sum(dsq * dsq, axis=1, keepdims=True),
                       axis=0, keepdims=True)                   # (1, 1)

        # ---- Decoder (+ fused sigmoid) ----
        h = quant
        for l in range(n_enc, n_layers):
            h = layer(h, l)                  # final: (R, DEC_PAD_LANES)

        # Lane-dense store: data in lanes [0, dec_valid); the MSE partial sum
        # is stashed in spare lane `dec_valid`; remaining pad lanes are 0.
        lane = lax.broadcasted_iota(jnp.int32, (1, h.shape[1]), 1)
        out = jnp.where(lane < dec_valid, h,
                        jnp.where(lane == dec_valid, dsum, 0.0))
        dec_ref[...] = out.astype(dec_ref.dtype)

    return kernel


# --------------------------------------------------------------------------
# Parameter init (deterministic synthetic weights -> fused B / bias constants)
# --------------------------------------------------------------------------
def init_params(key, n_hid, embedding_dim, n_embed, H=16, W=16, in_ch=3):
    layer_defs = [
        # (kind, ksize, cin, cout, stride, pad)
        ("conv", 4, in_ch, n_hid, 2, 1),
        ("conv", 4, n_hid, 2 * n_hid, 2, 1),
        ("conv", 3, 2 * n_hid, 4 * n_hid, 1, 1),
        ("conv", 1, 4 * n_hid, embedding_dim, 1, 0),      # quantize_conv
        ("conv", 3, embedding_dim, 2 * n_hid, 1, 1),      # decoder head
        ("convT", 4, 2 * n_hid, n_hid, 2, 1),
        ("convT", 4, n_hid, in_ch, 2, 1),
    ]
    n_layers = len(layer_defs)

    # Row-group packing chain: G_in = s*G_out (conv) / G_out//2 (convT),
    # chained backwards from the final output packing GF_OUT so that every
    # layer only ever needs packed-row offsets in {-1, 0, +1}.
    g_out = [0] * n_layers
    g_in = [0] * n_layers
    g = GF_OUT
    for l in reversed(range(n_layers)):
        kind, _, _, _, s, _ = layer_defs[l]
        g_out[l] = g
        g_in[l] = g * s if kind == "conv" else g // 2
        g = g_in[l]
    gf_in = g
    assert H % gf_in == 0

    keys = jax.random.split(key, 2 * n_layers + 1)
    layers = []
    needs_nb = []
    h_cur, w_cur = H, W
    lat = None
    for l, (kind, k, cin, cout, s, p) in enumerate(layer_defs):
        wt = np.asarray(0.1 * jax.random.normal(keys[2 * l], (k, k, cin, cout)),
                        np.float32)
        bias = np.asarray(0.01 * jax.random.normal(keys[2 * l + 1], (cout,)),
                          np.float32)
        if kind == "conv":
            B, oh, ow, nb = _build_conv_B(wt, h_cur, w_cur, g_in[l], g_out[l], s, p)
        else:
            B, oh, ow, nb = _build_convT_B(wt, h_cur, w_cur, g_in[l], g_out[l])
        Lout = g_out[l] * ow * cout
        bias_row = np.tile(bias, g_out[l] * ow)[None, :]
        if l == n_layers - 1:
            # Pad final output lanes to DEC_PAD_LANES -> unmasked lane stores.
            assert Lout < DEC_PAD_LANES and DEC_PAD_LANES % 128 == 0
            Bp = np.zeros((B.shape[0], DEC_PAD_LANES), np.float32)
            Bp[:, :Lout] = B
            bp = np.zeros((1, DEC_PAD_LANES), np.float32)
            bp[:, :Lout] = bias_row
            B, bias_row = Bp, bp
        layers.append((jnp.asarray(B, jnp.bfloat16),
                       jnp.asarray(bias_row, jnp.float32)))
        needs_nb.append(bool(nb))
        h_cur, w_cur = oh, ow
        if l == N_ENCODER_LAYERS - 1:
            lat = (oh, ow)

    dec_valid = g_out[-1] * w_cur * in_ch     # valid lanes of the output slab

    # Codebook and derived block-diagonal constants (kept in f32 for the VQ).
    Hl, Wl = lat
    D, Ke = embedding_dim, n_embed
    cb = np.asarray(jax.random.normal(keys[-1], (n_embed, embedding_dim)),
                    np.float32)
    cb_bd = np.zeros((Wl * D, Wl * Ke), np.float32)
    cb_place = np.zeros((Wl * Ke, Wl * D), np.float32)
    for xw in range(Wl):
        cb_bd[xw * D:(xw + 1) * D, xw * Ke:(xw + 1) * Ke] = cb.T
        cb_place[xw * Ke:(xw + 1) * Ke, xw * D:(xw + 1) * D] = cb
    e2t = np.tile(np.sum(cb * cb, axis=1), Wl)[None, :]   # (1, Wl*Ke)

    params = {
        "layers": layers,
        "cb_bd": jnp.asarray(cb_bd, jnp.float32),
        "e2": jnp.asarray(e2t, jnp.float32),
        "cb_place": jnp.asarray(cb_place, jnp.float32),
    }
    meta = {
        "needs_nb": tuple(needs_nb),
        "gf_in": gf_in,
        "gf_out": g_out[-1],
        "lat": (Hl, Wl),
        "D": D,
        "Ke": Ke,
        "dec_valid": dec_valid,
    }
    return params, meta


# --------------------------------------------------------------------------
# Forward wrapper: one pallas_call for the whole network
# --------------------------------------------------------------------------
def vqvae_forward(params, x_nchw, meta):
    N, C, H, W = x_nchw.shape
    layers = params["layers"]
    n_layers = len(layers)
    gf_in, gf_out = meta["gf_in"], meta["gf_out"]
    Hl, Wl = meta["lat"]
    D, Ke = meta["D"], meta["Ke"]
    dec_valid = meta["dec_valid"]
    R_in = H // gf_in
    R_out = H // gf_out

    # NCHW -> packed (N, R, G*W*C) bf16 (cheap one-time XLA reshape of the input)
    x_prep = (jnp.transpose(x_nchw, (0, 2, 3, 1))
              .reshape(N, R_in, gf_in * W * C).astype(jnp.bfloat16))

    flat_inputs = [x_prep]
    for (B, b) in layers:
        flat_inputs += [B, b]
    flat_inputs += [params["cb_bd"], params["e2"], params["cb_place"]]

    in_specs = [pl.BlockSpec((None, R_in, gf_in * W * C), lambda i: (i, 0, 0))]
    for arr in flat_inputs[1:]:
        nd = arr.ndim
        in_specs.append(pl.BlockSpec(arr.shape, lambda i, nd=nd: (0,) * nd))

    out_shape = jax.ShapeDtypeStruct((N, R_out, DEC_PAD_LANES), jnp.float32)
    out_spec = pl.BlockSpec((None, R_out, DEC_PAD_LANES), lambda i: (i, 0, 0))

    kernel = _make_kernel(n_layers, N_ENCODER_LAYERS, ACTS, meta["needs_nb"],
                          Wl, Ke, dec_valid)

    dec_raw = pl.pallas_call(
        kernel,
        grid=(N,),
        in_specs=in_specs,
        out_specs=out_spec,
        out_shape=out_shape,
        compiler_params=pltpu.CompilerParams(dimension_semantics=("parallel",)),
    )(*flat_inputs)

    # Unpack: valid lanes -> image; spare lane dec_valid of row 0 -> MSE partials.
    diff_parts = dec_raw[:, 0, dec_valid]                       # (N,)
    dec = dec_raw[:, :, :dec_valid].reshape(N, H, W, C).transpose(0, 3, 1, 2)
    diff = jnp.sum(diff_parts) / (N * Hl * Wl * D)
    return dec, diff[None]                                      # diff.unsqueeze(0)


if __name__ == "__main__":
    n_hid, embedding_dim, n_embed = 8, 16, 32
    key = jax.random.PRNGKey(0)
    pkey, xkey = jax.random.split(key)
    params, meta = init_params(pkey, n_hid, embedding_dim, n_embed,
                               H=16, W=16, in_ch=3)
    x = jax.random.normal(xkey, (2, 3, 16, 16), dtype=jnp.float32)  # NCHW

    fwd = jax.jit(lambda p, xx: vqvae_forward(p, xx, meta))
    recon, diff = fwd(params, x)
    jax.block_until_ready((recon, diff))

    assert recon.shape == (2, 3, 16, 16), recon.shape
    assert diff.shape == (1,), diff.shape
    assert bool(jnp.all(jnp.isfinite(recon))) and bool(jnp.isfinite(diff[0]))
    print("KERNEL_OK")
</pallas_src>

<mosaic_0001>
module attributes {stable_mosaic.version = 11 : i64} {
  func.func @kernel(%arg0: i32, %arg1: memref<1x4x192xbf16, #tpu.memory_space<vmem>>, %arg2: memref<576x128xbf16, #tpu.memory_space<vmem>>, %arg3: memref<1x128xf32, #tpu.memory_space<vmem>>, %arg4: memref<384x64xbf16, #tpu.memory_space<vmem>>, %arg5: memref<1x64xf32, #tpu.memory_space<vmem>>, %arg6: memref<192x128xbf16, #tpu.memory_space<vmem>>, %arg7: memref<1x128xf32, #tpu.memory_space<vmem>>, %arg8: memref<128x64xbf16, #tpu.memory_space<vmem>>, %arg9: memref<1x64xf32, #tpu.memory_space<vmem>>, %arg10: memref<192x64xbf16, #tpu.memory_space<vmem>>, %arg11: memref<1x64xf32, #tpu.memory_space<vmem>>, %arg12: memref<192x128xbf16, #tpu.memory_space<vmem>>, %arg13: memref<1x128xf32, #tpu.memory_space<vmem>>, %arg14: memref<384x256xbf16, #tpu.memory_space<vmem>>, %arg15: memref<1x256xf32, #tpu.memory_space<vmem>>, %arg16: memref<64x128xf32, #tpu.memory_space<vmem>>, %arg17: memref<1x128xf32, #tpu.memory_space<vmem>>, %arg18: memref<128x64xf32, #tpu.memory_space<vmem>>, %arg19: memref<1x4x256xf32, #tpu.memory_space<vmem>>) attributes {dimension_semantics = [#tpu.dimension_semantics<parallel>], iteration_bounds = array<i64: 2>, scalar_prefetch = 0 : i64, scratch_operands = 0 : i64, tpu.core_type = #tpu.core_type<tc>, window_params = [{transform_indices = @transform_0, window_bounds = array<i64: 1, 4, 192>}, {pipeline_mode = #tpu.pipeline_mode<synchronous>, transform_indices = @transform_1, window_bounds = array<i64: 576, 128>}, {pipeline_mode = #tpu.pipeline_mode<synchronous>, transform_indices = @transform_2, window_bounds = array<i64: 1, 128>}, {pipeline_mode = #tpu.pipeline_mode<synchronous>, transform_indices = @transform_3, window_bounds = array<i64: 384, 64>}, {pipeline_mode = #tpu.pipeline_mode<synchronous>, transform_indices = @transform_4, window_bounds = array<i64: 1, 64>}, {pipeline_mode = #tpu.pipeline_mode<synchronous>, transform_indices = @transform_5, window_bounds = array<i64: 192, 128>}, {pipeline_mode = #tpu.pipeline_mode<synchronous>, transform_indices = @transform_6, window_bounds = array<i64: 1, 128>}, {pipeline_mode = #tpu.pipeline_mode<synchronous>, transform_indices = @transform_7, window_bounds = array<i64: 128, 64>}, {pipeline_mode = #tpu.pipeline_mode<synchronous>, transform_indices = @transform_8, window_bounds = array<i64: 1, 64>}, {pipeline_mode = #tpu.pipeline_mode<synchronous>, transform_indices = @transform_9, window_bounds = array<i64: 192, 64>}, {pipeline_mode = #tpu.pipeline_mode<synchronous>, transform_indices = @transform_10, window_bounds = array<i64: 1, 64>}, {pipeline_mode = #tpu.pipeline_mode<synchronous>, transform_indices = @transform_11, window_bounds = array<i64: 192, 128>}, {pipeline_mode = #tpu.pipeline_mode<synchronous>, transform_indices = @transform_12, window_bounds = array<i64: 1, 128>}, {pipeline_mode = #tpu.pipeline_mode<synchronous>, transform_indices = @transform_13, window_bounds = array<i64: 384, 256>}, {pipeline_mode = #tpu.pipeline_mode<synchronous>, transform_indices = @transform_14, window_bounds = array<i64: 1, 256>}, {pipeline_mode = #tpu.pipeline_mode<synchronous>, transform_indices = @transform_15, window_bounds = array<i64: 64, 128>}, {pipeline_mode = #tpu.pipeline_mode<synchronous>, transform_indices = @transform_16, window_bounds = array<i64: 1, 128>}, {pipeline_mode = #tpu.pipeline_mode<synchronous>, transform_indices = @transform_17, window_bounds = array<i64: 128, 64>}, {transform_indices = @transform_18, window_bounds = array<i64: 1, 4, 256>}]} {
    %c0 = arith.constant 0 : index
    %c0_0 = arith.constant 0 : index
    %c0_1 = arith.constant 0 : index
    %0 = vector.load %arg1[%c0, %c0_0, %c0_1] : memref<1x4x192xbf16, #tpu.memory_space<vmem>>, vector<1x4x192xbf16>
    %1 = vector.shape_cast %0 : vector<1x4x192xbf16> to vector<4x192xbf16>
    %cst = arith.constant 0.000000e+00 : bf16
    %2 = vector.broadcast %cst : bf16 to vector<1x192xbf16>
    %3 = tpu.concatenate %2, %1, %2 in 0 : vector<1x192xbf16>, vector<4x192xbf16>, vector<1x192xbf16> -> vector<6x192xbf16>
    %4 = vector.extract_strided_slice %3 {offsets = [0, 0], sizes = [4, 192], strides = [1, 1]} : vector<6x192xbf16> to vector<4x192xbf16>
    %5 = vector.extract_strided_slice %3 {offsets = [1, 0], sizes = [4, 192], strides = [1, 1]} : vector<6x192xbf16> to vector<4x192xbf16>
    %6 = vector.extract_strided_slice %3 {offsets = [2, 0], sizes = [4, 192], strides = [1, 1]} : vector<6x192xbf16> to vector<4x192xbf16>
    %7 = tpu.concatenate %4, %5, %6 in 1 : vector<4x192xbf16>, vector<4x192xbf16>, vector<4x192xbf16> -> vector<4x576xbf16>
    %c0_2 = arith.constant 0 : index
    %c0_3 = arith.constant 0 : index
    %8 = vector.load %arg2[%c0_2, %c0_3] : memref<576x128xbf16, #tpu.memory_space<vmem>>, vector<576x128xbf16>
    %cst_4 = arith.constant dense<0.000000e+00> : vector<4x128xf32>
    %9 = tpu.matmul %7, %8, %cst_4 {dimension_numbers = #tpu.dot_dimension_numbers<[1], [0], [0], [1], [0, 0, 1, 1], [], []>} : vector<4x576xbf16>, vector<576x128xbf16>, vector<4x128xf32> -> vector<4x128xf32>
    %c0_5 = arith.constant 0 : index
    %c0_6 = arith.constant 0 : index
    %10 = vector.load %arg3[%c0_5, %c0_6] : memref<1x128xf32, #tpu.memory_space<vmem>>, vector<1x128xf32>
    %11 = vector.broadcast %10 : vector<1x128xf32> to vector<4x128xf32>
    %12 = arith.addf %9, %11 : vector<4x128xf32>
    %cst_7 = arith.constant 0.000000e+00 : f32
    %13 = vector.broadcast %cst_7 : f32 to vector<4x128xf32>
    %14 = arith.maximumf %12, %13 : vector<4x128xf32>
    %15 = arith.truncf %14 : vector<4x128xf32> to vector<4x128xbf16>
    %cst_8 = arith.constant 0.000000e+00 : bf16
    %16 = vector.broadcast %cst_8 : bf16 to vector<1x128xbf16>
    %17 = tpu.concatenate %16, %15, %16 in 0 : vector<1x128xbf16>, vector<4x128xbf16>, vector<1x128xbf16> -> vector<6x128xbf16>
    %18 = vector.extract_strided_slice %17 {offsets = [0, 0], sizes = [4, 128], strides = [1, 1]} : vector<6x128xbf16> to vector<4x128xbf16>
    %19 = vector.extract_strided_slice %17 {offsets = [1, 0], sizes = [4, 128], strides = [1, 1]} : vector<6x128xbf16> to vector<4x128xbf16>
    %20 = vector.extract_strided_slice %17 {offsets = [2, 0], sizes = [4, 128], strides = [1, 1]} : vector<6x128xbf16> to vector<4x128xbf16>
    %21 = tpu.concatenate %18, %19, %20 in 1 : vector<4x128xbf16>, vector<4x128xbf16>, vector<4x128xbf16> -> vector<4x384xbf16>
    %c0_9 = arith.constant 0 : index
    %c0_10 = arith.constant 0 : index
    %22 = vector.load %arg4[%c0_9, %c0_10] : memref<384x64xbf16, #tpu.memory_space<vmem>>, vector<384x64xbf16>
    %cst_11 = arith.constant dense<0.000000e+00> : vector<4x64xf32>
    %23 = tpu.matmul %21, %22, %cst_11 {dimension_numbers = #tpu.dot_dimension_numbers<[1], [0], [0], [1], [0, 0, 1, 1], [], []>} : vector<4x384xbf16>, vector<384x64xbf16>, vector<4x64xf32> -> vector<4x64xf32>
    %c0_12 = arith.constant 0 : index
    %c0_13 = arith.constant 0 : index
    %24 = vector.load %arg5[%c0_12, %c0_13] : memref<1x64xf32, #tpu.memory_space<vmem>>, vector<1x64xf32>
    %25 = vector.broadcast %24 : vector<1x64xf32> to vector<4x64xf32>
    %26 = arith.addf %23, %25 : vector<4x64xf32>
    %cst_14 = arith.constant 0.000000e+00 : f32
    %27 = vector.broadcast %cst_14 : f32 to vector<4x64xf32>
    %28 = arith.maximumf %26, %27 : vector<4x64xf32>
    %29 = arith.truncf %28 : vector<4x64xf32> to vector<4x64xbf16>
    %cst_15 = arith.constant 0.000000e+00 : bf16
    %30 = vector.broadcast %cst_15 : bf16 to vector<1x64xbf16>
    %31 = tpu.concatenate %30, %29, %30 in 0 : vector<1x64xbf16>, vector<4x64xbf16>, vector<1x64xbf16> -> vector<6x64xbf16>
    %32 = vector.extract_strided_slice %31 {offsets = [0, 0], sizes = [4, 64], strides = [1, 1]} : vector<6x64xbf16> to vector<4x64xbf16>
    %33 = vector.extract_strided_slice %31 {offsets = [1, 0], sizes = [4, 64], strides = [1, 1]} : vector<6x64xbf16> to vector<4x64xbf16>
    %34 = vector.extract_strided_slice %31 {offsets = [2, 0], sizes = [4, 64], strides = [1, 1]} : vector<6x64xbf16> to vector<4x64xbf16>
    %35 = tpu.concatenate %32, %33, %34 in 1 : vector<4x64xbf16>, vector<4x64xbf16>, vector<4x64xbf16> -> vector<4x192xbf16>
    %c0_16 = arith.constant 0 : index
    %c0_17 = arith.constant 0 : index
    %36 = vector.load %arg6[%c0_16, %c0_17] : memref<192x128xbf16, #tpu.memory_space<vmem>>, vector<192x128xbf16>
    %cst_18 = arith.constant dense<0.000000e+00> : vector<4x128xf32>
    %37 = tpu.matmul %35, %36, %cst_18 {dimension_numbers = #tpu.dot_dimension_numbers<[1], [0], [0], [1], [0, 0, 1, 1], [], []>} : vector<4x192xbf16>, vector<192x128xbf16>, vector<4x128xf32> -> vector<4x128xf32>
    %c0_19 = arith.constant 0 : index
    %c0_20 = arith.constant 0 : index
    %38 = vector.load %arg7[%c0_19, %c0_20] : memref<1x128xf32, #tpu.memory_space<vmem>>, vector<1x128xf32>
    %39 = vector.broadcast %38 : vector<1x128xf32> to vector<4x128xf32>
    %40 = arith.addf %37, %39 : vector<4x128xf32>
    %cst_21 = arith.constant 0.000000e+00 : f32
    %41 = vector.broadcast %cst_21 : f32 to vector<4x128xf32>
    %42 = arith.maximumf %40, %41 : vector<4x128xf32>
    %43 = arith.truncf %42 : vector<4x128xf32> to vector<4x128xbf16>
    %c0_22 = arith.constant 0 : index
    %c0_23 = arith.constant 0 : index
    %44 = vector.load %arg8[%c0_22, %c0_23] : memref<128x64xbf16, #tpu.memory_space<vmem>>, vector<128x64xbf16>
    %cst_24 = arith.constant dense<0.000000e+00> : vector<4x64xf32>
    %45 = tpu.matmul %43, %44, %cst_24 {dimension_numbers = #tpu.dot_dimension_numbers<[1], [0], [0], [1], [0, 0, 1, 1], [], []>} : vector<4x128xbf16>, vector<128x64xbf16>, vector<4x64xf32> -> vector<4x64xf32>
    %c0_25 = arith.constant 0 : index
    %c0_26 = arith.constant 0 : index
    %46 = vector.load %arg9[%c0_25, %c0_26] : memref<1x64xf32, #tpu.memory_space<vmem>>, vector<1x64xf32>
    %47 = vector.broadcast %46 : vector<1x64xf32> to vector<4x64xf32>
    %48 = arith.addf %45, %47 : vector<4x64xf32>
    %c0_27 = arith.constant 0 : index
    %c0_28 = arith.constant 0 : index
    %49 = vector.load %arg16[%c0_27, %c0_28] : memref<64x128xf32, #tpu.memory_space<vmem>>, vector<64x128xf32>
    %cst_29 = arith.constant dense<0.000000e+00> : vector<4x128xf32>
    %50 = tpu.matmul %48, %49, %cst_29 {dimension_numbers = #tpu.dot_dimension_numbers<[1], [0], [0], [1], [0, 0, 1, 1], [], []>} : vector<4x64xf32>, vector<64x128xf32>, vector<4x128xf32> -> vector<4x128xf32>
    %c0_30 = arith.constant 0 : index
    %c0_31 = arith.constant 0 : index
    %51 = vector.load %arg17[%c0_30, %c0_31] : memref<1x128xf32, #tpu.memory_space<vmem>>, vector<1x128xf32>
    %cst_32 = arith.constant 2.000000e+00 : f32
    %52 = vector.broadcast %cst_32 : f32 to vector<4x128xf32>
    %53 = arith.mulf %52, %50 : vector<4x128xf32>
    %54 = vector.broadcast %51 : vector<1x128xf32> to vector<4x128xf32>
    %55 = arith.subf %54, %53 : vector<4x128xf32>
    %56 = vector.extract_strided_slice %55 {offsets = [0, 0], sizes = [4, 32], strides = [1, 1]} : vector<4x128xf32> to vector<4x32xf32>
    %cst_33 = arith.constant dense<0x7F800000> : vector<4xf32>
    %57 = vector.multi_reduction <minimumf>, %56, %cst_33 [1] : vector<4x32xf32> to vector<4xf32>
    %58 = vector.shape_cast %57 : vector<4xf32> to vector<4x1xf32>
    %59 = tpu.iota {dimensions = array<i32: 1>} : vector<4x32xi32>
    %60 = vector.broadcast %58 : vector<4x1xf32> to vector<4x32xf32>
    %61 = arith.cmpf oeq, %56, %60 : vector<4x32xf32>
    %c32_i32 = arith.constant 32 : i32
    %62 = vector.broadcast %c32_i32 : i32 to vector<4x32xi32>
    %63 = arith.select %61, %59, %62 : vector<4x32xi1>, vector<4x32xi32>
    %cst_34 = arith.constant dense<2147483647> : vector<4xi32>
    %64 = vector.multi_reduction <minsi>, %63, %cst_34 [1] : vector<4x32xi32> to vector<4xi32>
    %65 = vector.shape_cast %64 : vector<4xi32> to vector<4x1xi32>
    %66 = vector.broadcast %65 : vector<4x1xi32> to vector<4x32xi32>
    %67 = arith.cmpi eq, %59, %66 : vector<4x32xi32>
    %68 = arith.extui %67 : vector<4x32xi1> to vector<4x32xi32>
    %69 = arith.sitofp %68 : vector<4x32xi32> to vector<4x32xf32>
    %70 = vector.extract_strided_slice %55 {offsets = [0, 32], sizes = [4, 32], strides = [1, 1]} : vector<4x128xf32> to vector<4x32xf32>
    %cst_35 = arith.constant dense<0x7F800000> : vector<4xf32>
    %71 = vector.multi_reduction <minimumf>, %70, %cst_35 [1] : vector<4x32xf32> to vector<4xf32>
    %72 = vector.shape_cast %71 : vector<4xf32> to vector<4x1xf32>
    %73 = tpu.iota {dimensions = array<i32: 1>} : vector<4x32xi32>
    %74 = vector.broadcast %72 : vector<4x1xf32> to vector<4x32xf32>
    %75 = arith.cmpf oeq, %70, %74 : vector<4x32xf32>
    %c32_i32_36 = arith.constant 32 : i32
    %76 = vector.broadcast %c32_i32_36 : i32 to vector<4x32xi32>
    %77 = arith.select %75, %73, %76 : vector<4x32xi1>, vector<4x32xi32>
    %cst_37 = arith.constant dense<2147483647> : vector<4xi32>
    %78 = vector.multi_reduction <minsi>, %77, %cst_37 [1] : vector<4x32xi32> to vector<4xi32>
    %79 = vector.shape_cast %78 : vector<4xi32> to vector<4x1xi32>
    %80 = vector.broadcast %79 : vector<4x1xi32> to vector<4x32xi32>
    %81 = arith.cmpi eq, %73, %80 : vector<4x32xi32>
    %82 = arith.extui %81 : vector<4x32xi1> to vector<4x32xi32>
    %83 = arith.sitofp %82 : vector<4x32xi32> to vector<4x32xf32>
    %84 = vector.extract_strided_slice %55 {offsets = [0, 64], sizes = [4, 32], strides = [1, 1]} : vector<4x128xf32> to vector<4x32xf32>
    %cst_38 = arith.constant dense<0x7F800000> : vector<4xf32>
    %85 = vector.multi_reduction <minimumf>, %84, %cst_38 [1] : vector<4x32xf32> to vector<4xf32>
    %86 = vector.shape_cast %85 : vector<4xf32> to vector<4x1xf32>
    %87 = tpu.iota {dimensions = array<i32: 1>} : vector<4x32xi32>
    %88 = vector.broadcast %86 : vector<4x1xf32> to vector<4x32xf32>
    %89 = arith.cmpf oeq, %84, %88 : vector<4x32xf32>
    %c32_i32_39 = arith.constant 32 : i32
    %90 = vector.broadcast %c32_i32_39 : i32 to vector<4x32xi32>
    %91 = arith.select %89, %87, %90 : vector<4x32xi1>, vector<4x32xi32>
    %cst_40 = arith.constant dense<2147483647> : vector<4xi32>
    %92 = vector.multi_reduction <minsi>, %91, %cst_40 [1] : vector<4x32xi32> to vector<4xi32>
    %93 = vector.shape_cast %92 : vector<4xi32> to vector<4x1xi32>
    %94 = vector.broadcast %93 : vector<4x1xi32> to vector<4x32xi32>
    %95 = arith.cmpi eq, %87, %94 : vector<4x32xi32>
    %96 = arith.extui %95 : vector<4x32xi1> to vector<4x32xi32>
    %97 = arith.sitofp %96 : vector<4x32xi32> to vector<4x32xf32>
    %98 = vector.extract_strided_slice %55 {offsets = [0, 96], sizes = [4, 32], strides = [1, 1]} : vector<4x128xf32> to vector<4x32xf32>
    %cst_41 = arith.constant dense<0x7F800000> : vector<4xf32>
    %99 = vector.multi_reduction <minimumf>, %98, %cst_41 [1] : vector<4x32xf32> to vector<4xf32>
    %100 = vector.shape_cast %99 : vector<4xf32> to vector<4x1xf32>
    %101 = tpu.iota {dimensions = array<i32: 1>} : vector<4x32xi32>
    %102 = vector.broadcast %100 : vector<4x1xf32> to vector<4x32xf32>
    %103 = arith.cmpf oeq, %98, %102 : vector<4x32xf32>
    %c32_i32_42 = arith.constant 32 : i32
    %104 = vector.broadcast %c32_i32_42 : i32 to vector<4x32xi32>
    %105 = arith.select %103, %101, %104 : vector<4x32xi1>, vector<4x32xi32>
    %cst_43 = arith.constant dense<2147483647> : vector<4xi32>
    %106 = vector.multi_reduction <minsi>, %105, %cst_43 [1] : vector<4x32xi32> to vector<4xi32>
    %107 = vector.shape_cast %106 : vector<4xi32> to vector<4x1xi32>
    %108 = vector.broadcast %107 : vector<4x1xi32> to vector<4x32xi32>
    %109 = arith.cmpi eq, %101, %108 : vector<4x32xi32>
    %110 = arith.extui %109 : vector<4x32xi1> to vector<4x32xi32>
    %111 = arith.sitofp %110 : vector<4x32xi32> to vector<4x32xf32>
    %112 = tpu.concatenate %69, %83, %97, %111 in 1 : vector<4x32xf32>, vector<4x32xf32>, vector<4x32xf32>, vector<4x32xf32> -> vector<4x128xf32>
    %c0_44 = arith.constant 0 : index
    %c0_45 = arith.constant 0 : index
    %113 = vector.load %arg18[%c0_44, %c0_45] : memref<128x64xf32, #tpu.memory_space<vmem>>, vector<128x64xf32>
    %cst_46 = arith.constant dense<0.000000e+00> : vector<4x64xf32>
    %114 = tpu.matmul %112, %113, %cst_46 {dimension_numbers = #tpu.dot_dimension_numbers<[1], [0], [0], [1], [0, 0, 1, 1], [], []>} : vector<4x128xf32>, vector<128x64xf32>, vector<4x64xf32> -> vector<4x64xf32>
    %115 = arith.subf %114, %48 : vector<4x64xf32>
    %116 = arith.mulf %115, %115 : vector<4x64xf32>
    %cst_47 = arith.constant dense<0.000000e+00> : vector<4xf32>
    %117 = vector.multi_reduction <add>, %116, %cst_47 [1] : vector<4x64xf32> to vector<4xf32>
    %118 = vector.shape_cast %117 : vector<4xf32> to vector<4x1xf32>
    %cst_48 = arith.constant dense<0.000000e+00> : vector<1xf32>
    %119 = vector.multi_reduction <add>, %118, %cst_48 [0] : vector<4x1xf32> to vector<1xf32>
    %120 = vector.shape_cast %119 : vector<1xf32> to vector<1x1xf32>
    %121 = arith.truncf %114 : vector<4x64xf32> to vector<4x64xbf16>
    %cst_49 = arith.constant 0.000000e+00 : bf16
    %122 = vector.broadcast %cst_49 : bf16 to vector<1x64xbf16>
    %123 = tpu.concatenate %122, %121, %122 in 0 : vector<1x64xbf16>, vector<4x64xbf16>, vector<1x64xbf16> -> vector<6x64xbf16>
    %124 = vector.extract_strided_slice %123 {offsets = [0, 0], sizes = [4, 64], strides = [1, 1]} : vector<6x64xbf16> to vector<4x64xbf16>
    %125 = vector.extract_strided_slice %123 {offsets = [1, 0], sizes = [4, 64], strides = [1, 1]} : vector<6x64xbf16> to vector<4x64xbf16>
    %126 = vector.extract_strided_slice %123 {offsets = [2, 0], sizes = [4, 64], strides = [1, 1]} : vector<6x64xbf16> to vector<4x64xbf16>
    %127 = tpu.concatenate %124, %125, %126 in 1 : vector<4x64xbf16>, vector<4x64xbf16>, vector<4x64xbf16> -> vector<4x192xbf16>
    %c0_50 = arith.constant 0 : index
    %c0_51 = arith.constant 0 : index
    %128 = vector.load %arg10[%c0_50, %c0_51] : memref<192x64xbf16, #tpu.memory_space<vmem>>, vector<192x64xbf16>
    %cst_52 = arith.constant dense<0.000000e+00> : vector<4x64xf32>
    %129 = tpu.matmul %127, %128, %cst_52 {dimension_numbers = #tpu.dot_dimension_numbers<[1], [0], [0], [1], [0, 0, 1, 1], [], []>} : vector<4x192xbf16>, vector<192x64xbf16>, vector<4x64xf32> -> vector<4x64xf32>
    %c0_53 = arith.constant 0 : index
    %c0_54 = arith.constant 0 : index
    %130 = vector.load %arg11[%c0_53, %c0_54] : memref<1x64xf32, #tpu.memory_space<vmem>>, vector<1x64xf32>
    %131 = vector.broadcast %130 : vector<1x64xf32> to vector<4x64xf32>
    %132 = arith.addf %129, %131 : vector<4x64xf32>
    %cst_55 = arith.constant 0.000000e+00 : f32
    %133 = vector.broadcast %cst_55 : f32 to vector<4x64xf32>
    %134 = arith.maximumf %132, %133 : vector<4x64xf32>
    %135 = arith.truncf %134 : vector<4x64xf32> to vector<4x64xbf16>
    %cst_56 = arith.constant 0.000000e+00 : bf16
    %136 = vector.broadcast %cst_56 : bf16 to vector<1x64xbf16>
    %137 = tpu.concatenate %136, %135, %136 in 0 : vector<1x64xbf16>, vector<4x64xbf16>, vector<1x64xbf16> -> vector<6x64xbf16>
    %138 = vector.extract_strided_slice %137 {offsets = [0, 0], sizes = [4, 64], strides = [1, 1]} : vector<6x64xbf16> to vector<4x64xbf16>
    %139 = vector.extract_strided_slice %137 {offsets = [1, 0], sizes = [4, 64], strides = [1, 1]} : vector<6x64xbf16> to vector<4x64xbf16>
    %140 = vector.extract_strided_slice %137 {offsets = [2, 0], sizes = [4, 64], strides = [1, 1]} : vector<6x64xbf16> to vector<4x64xbf16>
    %141 = tpu.concatenate %138, %139, %140 in 1 : vector<4x64xbf16>, vector<4x64xbf16>, vector<4x64xbf16> -> vector<4x192xbf16>
    %c0_57 = arith.constant 0 : index
    %c0_58 = arith.constant 0 : index
    %142 = vector.load %arg12[%c0_57, %c0_58] : memref<192x128xbf16, #tpu.memory_space<vmem>>, vector<192x128xbf16>
    %cst_59 = arith.constant dense<0.000000e+00> : vector<4x128xf32>
    %143 = tpu.matmul %141, %142, %cst_59 {dimension_numbers = #tpu.dot_dimension_numbers<[1], [0], [0], [1], [0, 0, 1, 1], [], []>} : vector<4x192xbf16>, vector<192x128xbf16>, vector<4x128xf32> -> vector<4x128xf32>
    %c0_60 = arith.constant 0 : index
    %c0_61 = arith.constant 0 : index
    %144 = vector.load %arg13[%c0_60, %c0_61] : memref<1x128xf32, #tpu.memory_space<vmem>>, vector<1x128xf32>
    %145 = vector.broadcast %144 : vector<1x128xf32> to vector<4x128xf32>
    %146 = arith.addf %143, %145 : vector<4x128xf32>
    %cst_62 = arith.constant 0.000000e+00 : f32
    %147 = vector.broadcast %cst_62 : f32 to vector<4x128xf32>
    %148 = arith.maximumf %146, %147 : vector<4x128xf32>
    %149 = arith.truncf %148 : vector<4x128xf32> to vector<4x128xbf16>
    %cst_63 = arith.constant 0.000000e+00 : bf16
    %150 = vector.broadcast %cst_63 : bf16 to vector<1x128xbf16>
    %151 = tpu.concatenate %150, %149, %150 in 0 : vector<1x128xbf16>, vector<4x128xbf16>, vector<1x128xbf16> -> vector<6x128xbf16>
    %152 = vector.extract_strided_slice %151 {offsets = [0, 0], sizes = [4, 128], strides = [1, 1]} : vector<6x128xbf16> to vector<4x128xbf16>
    %153 = vector.extract_strided_slice %151 {offsets = [1, 0], sizes = [4, 128], strides = [1, 1]} : vector<6x128xbf16> to vector<4x128xbf16>
    %154 = vector.extract_strided_slice %151 {offsets = [2, 0], sizes = [4, 128], strides = [1, 1]} : vector<6x128xbf16> to vector<4x128xbf16>
    %155 = tpu.concatenate %152, %153, %154 in 1 : vector<4x128xbf16>, vector<4x128xbf16>, vector<4x128xbf16> -> vector<4x384xbf16>
    %c0_64 = arith.constant 0 : index
    %c0_65 = arith.constant 0 : index
    %156 = vector.load %arg14[%c0_64, %c0_65] : memref<384x256xbf16, #tpu.memory_space<vmem>>, vector<384x256xbf16>
    %cst_66 = arith.constant dense<0.000000e+00> : vector<4x256xf32>
    %157 = tpu.matmul %155, %156, %cst_66 {dimension_numbers = #tpu.dot_dimension_numbers<[1], [0], [0], [1], [0, 0, 1, 1], [], []>} : vector<4x384xbf16>, vector<384x256xbf16>, vector<4x256xf32> -> vector<4x256xf32>
    %c0_67 = arith.constant 0 : index
    %c0_68 = arith.constant 0 : index
    %158 = vector.load %arg15[%c0_67, %c0_68] : memref<1x256xf32, #tpu.memory_space<vmem>>, vector<1x256xf32>
    %159 = vector.broadcast %158 : vector<1x256xf32> to vector<4x256xf32>
    %160 = arith.addf %157, %159 : vector<4x256xf32>
    %161 = arith.negf %160 : vector<4x256xf32>
    %162 = math.exp %161 : vector<4x256xf32>
    %cst_69 = arith.constant 1.000000e+00 : f32
    %163 = vector.broadcast %cst_69 : f32 to vector<4x256xf32>
    %164 = arith.addf %163, %162 : vector<4x256xf32>
    %165 = arith.divf %163, %164 : vector<4x256xf32>
    %166 = tpu.iota {dimensions = array<i32: 1>} : vector<1x256xi32>
    %c192_i32 = arith.constant 192 : i32
    %167 = vector.broadcast %c192_i32 : i32 to vector<1x256xi32>
    %168 = arith.cmpi slt, %166, %167 : vector<1x256xi32>
    %c192_i32_70 = arith.constant 192 : i32
    %169 = vector.broadcast %c192_i32_70 : i32 to vector<1x256xi32>
    %170 = arith.cmpi eq, %166, %169 : vector<1x256xi32>
    %cst_71 = arith.constant 0.000000e+00 : f32
    %171 = vector.shape_cast %120 : vector<1x1xf32> to vector<1x1xf32>
    %172 = vector.broadcast %171 : vector<1x1xf32> to vector<1x256xf32>
    %173 = vector.broadcast %cst_71 : f32 to vector<1x256xf32>
    %174 = arith.select %170, %172, %173 : vector<1x256xi1>, vector<1x256xf32>
    %175 = vector.shape_cast %168 : vector<1x256xi1> to vector<1x256xi1>
    %176 = vector.broadcast %175 : vector<1x256xi1> to vector<4x256xi1>
    %177 = vector.shape_cast %174 : vector<1x256xf32> to vector<1x256xf32>
    %178 = vector.broadcast %177 : vector<1x256xf32> to vector<4x256xf32>
    %179 = arith.select %176, %165, %178 : vector<4x256xi1>, vector<4x256xf32>
    %c0_72 = arith.constant 0 : index
    %c0_73 = arith.constant 0 : index
    %c0_74 = arith.constant 0 : index
    %180 = vector.load %arg19[%c0_72, %c0_73, %c0_74] : memref<1x4x256xf32, #tpu.memory_space<vmem>>, vector<1x4x256xf32>
    %181 = vector.shape_cast %180 : vector<1x4x256xf32> to vector<4x256xf32>
    %182 = vector.shape_cast %179 : vector<4x256xf32> to vector<1x4x256xf32>
    tpu.vector_store %arg19[%c0_72, %c0_73, %c0_74], %182 {strides = array<i32>} : memref<1x4x256xf32, #tpu.memory_space<vmem>>, vector<1x4x256xf32>,
    return
  }
  func.func @transform_0(%arg0: i32) -> (i32, i32, i32) {
    %c0_i32 = arith.constant 0 : i32
    %c0_i32_0 = arith.constant 0 : i32
    %c0_i32_1 = arith.constant 0 : i32
    return %arg0, %c0_i32, %c0_i32_0 : i32, i32, i32
  }
  func.func @transform_1(%arg0: i32) -> (i32, i32) {
    %c0_i32 = arith.constant 0 : i32
    %c0_i32_0 = arith.constant 0 : i32
    %c0_i32_1 = arith.constant 0 : i32
    return %c0_i32, %c0_i32_0 : i32, i32
  }
  func.func @transform_2(%arg0: i32) -> (i32, i32) {
    %c0_i32 = arith.constant 0 : i32
    %c0_i32_0 = arith.constant 0 : i32
    %c0_i32_1 = arith.constant 0 : i32
    return %c0_i32, %c0_i32_0 : i32, i32
  }
  func.func @transform_3(%arg0: i32) -> (i32, i32) {
    %c0_i32 = arith.constant 0 : i32
    %c0_i32_0 = arith.constant 0 : i32
    %c0_i32_1 = arith.constant 0 : i32
    return %c0_i32, %c0_i32_0 : i32, i32
  }
  func.func @transform_4(%arg0: i32) -> (i32, i32) {
    %c0_i32 = arith.constant 0 : i32
    %c0_i32_0 = arith.constant 0 : i32
    %c0_i32_1 = arith.constant 0 : i32
    return %c0_i32, %c0_i32_0 : i32, i32
  }
  func.func @transform_5(%arg0: i32) -> (i32, i32) {
    %c0_i32 = arith.constant 0 : i32
    %c0_i32_0 = arith.constant 0 : i32
    %c0_i32_1 = arith.constant 0 : i32
    return %c0_i32, %c0_i32_0 : i32, i32
  }
  func.func @transform_6(%arg0: i32) -> (i32, i32) {
    %c0_i32 = arith.constant 0 : i32
    %c0_i32_0 = arith.constant 0 : i32
    %c0_i32_1 = arith.constant 0 : i32
    return %c0_i32, %c0_i32_0 : i32, i32
  }
  func.func @transform_7(%arg0: i32) -> (i32, i32) {
    %c0_i32 = arith.constant 0 : i32
    %c0_i32_0 = arith.constant 0 : i32
    %c0_i32_1 = arith.constant 0 : i32
    return %c0_i32, %c0_i32_0 : i32, i32
  }
  func.func @transform_8(%arg0: i32) -> (i32, i32) {
    %c0_i32 = arith.constant 0 : i32
    %c0_i32_0 = arith.constant 0 : i32
    %c0_i32_1 = arith.constant 0 : i32
    return %c0_i32, %c0_i32_0 : i32, i32
  }
  func.func @transform_9(%arg0: i32) -> (i32, i32) {
    %c0_i32 = arith.constant 0 : i32
    %c0_i32_0 = arith.constant 0 : i32
    %c0_i32_1 = arith.constant 0 : i32
    return %c0_i32, %c0_i32_0 : i32, i32
  }
  func.func @transform_10(%arg0: i32) -> (i32, i32) {
    %c0_i32 = arith.constant 0 : i32
    %c0_i32_0 = arith.constant 0 : i32
    %c0_i32_1 = arith.constant 0 : i32
    return %c0_i32, %c0_i32_0 : i32, i32
  }
  func.func @transform_11(%arg0: i32) -> (i32, i32) {
    %c0_i32 = arith.constant 0 : i32
    %c0_i32_0 = arith.constant 0 : i32
    %c0_i32_1 = arith.constant 0 : i32
    return %c0_i32, %c0_i32_0 : i32, i32
  }
  func.func @transform_12(%arg0: i32) -> (i32, i32) {
    %c0_i32 = arith.constant 0 : i32
    %c0_i32_0 = arith.constant 0 : i32
    %c0_i32_1 = arith.constant 0 : i32
    return %c0_i32, %c0_i32_0 : i32, i32
  }
  func.func @transform_13(%arg0: i32) -> (i32, i32) {
    %c0_i32 = arith.constant 0 : i32
    %c0_i32_0 = arith.constant 0 : i32
    %c0_i32_1 = arith.constant 0 : i32
    return %c0_i32, %c0_i32_0 : i32, i32
  }
  func.func @transform_14(%arg0: i32) -> (i32, i32) {
    %c0_i32 = arith.constant 0 : i32
    %c0_i32_0 = arith.constant 0 : i32
    %c0_i32_1 = arith.constant 0 : i32
    return %c0_i32, %c0_i32_0 : i32, i32
  }
  func.func @transform_15(%arg0: i32) -> (i32, i32) {
    %c0_i32 = arith.constant 0 : i32
    %c0_i32_0 = arith.constant 0 : i32
    %c0_i32_1 = arith.constant 0 : i32
    return %c0_i32, %c0_i32_0 : i32, i32
  }
  func.func @transform_16(%arg0: i32) -> (i32, i32) {
    %c0_i32 = arith.constant 0 : i32
    %c0_i32_0 = arith.constant 0 : i32
    %c0_i32_1 = arith.constant 0 : i32
    return %c0_i32, %c0_i32_0 : i32, i32
  }
  func.func @transform_17(%arg0: i32) -> (i32, i32) {
    %c0_i32 = arith.constant 0 : i32
    %c0_i32_0 = arith.constant 0 : i32
    %c0_i32_1 = arith.constant 0 : i32
    return %c0_i32, %c0_i32_0 : i32, i32
  }
  func.func @transform_18(%arg0: i32) -> (i32, i32, i32) {
    %c0_i32 = arith.constant 0 : i32
    %c0_i32_0 = arith.constant 0 : i32
    %c0_i32_1 = arith.constant 0 : i32
    return %arg0, %c0_i32, %c0_i32_0 : i32, i32, i32
  }
}

</mosaic_0001>

<bundles_post_ra>
// kernel: _lambda_.1
= control target key start
LH: loop header
LB: loop body
LE: loop exit
PB: predicated region body
PF: predicated region fallthrough
CT: control target
= control target key end

     0   :  { %s3548_s27 = smov 0   ;;  %s4311_s0 = inlined_call_operand.vmem [shape: bf16[2,4,192], index: 0, kind: input, shape index: {}]   ;;  %s4312_s1 = inlined_call_operand.vmem [shape: bf16[576,128], index: 1, kind: input, shape index: {}]   ;;  %s4313_s2 = inlined_call_operand.vmem [shape: f32[1,128], index: 2, kind: input, shape index: {}]   ;;  %s4314_s3 = inlined_call_operand.vmem [shape: bf16[384,64], index: 3, kind: input, shape index: {}]   ;;  %s4315_s4 = inlined_call_operand.vmem [shape: f32[1,64], index: 4, kind: input, shape index: {}]   ;;  %s4316_s5 = inlined_call_operand.vmem [shape: bf16[192,128], index: 5, kind: input, shape index: {}]   ;;  %s4317_s6 = inlined_call_operand.vmem [shape: f32[1,128], index: 6, kind: input, shape index: {}]   ;;  %s4318_s7 = inlined_call_operand.vmem [shape: bf16[128,64], index: 7, kind: input, shape index: {}]   ;;  %s4319_s8 = inlined_call_operand.vmem [shape: f32[1,64], index: 8, kind: input, shape index: {}]   ;;  %s4320_s9 = inlined_call_operand.vmem [shape: bf16[192,64], index: 9, kind: input, shape index: {}]   ;;  %s4321_s10 = inlined_call_operand.vmem [shape: f32[1,64], index: 10, kind: input, shape index: {}]   ;;  %s4322_s11 = inlined_call_operand.vmem [shape: bf16[192,128], index: 11, kind: input, shape index: {}]   ;;  %s4323_s12 = inlined_call_operand.vmem [shape: f32[1,128], index: 12, kind: input, shape index: {}]   ;;  %s4324_s13 = inlined_call_operand.vmem [shape: bf16[384,256], index: 13, kind: input, shape index: {}]   ;;  %s4325_s14 = inlined_call_operand.vmem [shape: f32[1,256], index: 14, kind: input, shape index: {}]   ;;  %s4326_s15 = inlined_call_operand.vmem [shape: f32[64,128], index: 15, kind: input, shape index: {}]   ;;  %s4327_s16 = inlined_call_operand.vmem [shape: f32[1,128], index: 16, kind: input, shape index: {}]   ;;  %s4328_s17 = inlined_call_operand.vmem [shape: f32[128,64], index: 17, kind: input, shape index: {}]   ;;  %s4329_s18 = inlined_call_operand.vmem [shape: f32[2,4,256], index: 18, kind: output, shape index: {}]  }
   0x1   :  { %4331 = sst [smem:[#allocation2_spill]] %s4311_s0 }
   0x2   :  { %4332 = sst [smem:[#allocation3_spill]] %s4312_s1 }
   0x3   :  { %4333 = sst [smem:[#allocation4_spill]] %s4313_s2 }
   0x4 LB: > { %s2792_s28 = sadd.s32 4294967295, %s3444_s27   ;;  %p2796_p0 = scmp.ge.s32.totalorder %s3444_s27, 1  ;;  %s3444_s27 = sphi %s3548_s27, %s28_s27  }
   0x5   : > { %p512_p1 = scmp.lt.s32.totalorder %s3444_s27, 3 }
   0x7   : > { %p513_p2 = pnand %p2796_p0, %p512_p1 }
   0x8   : > { %p566_p3 = scmp.lt.s32.totalorder (!%p513_p2), %s2792_s28, 1  ;;  %vm604_vm0 = vsmask.f32 (!%p513_p2), 256  ;;  %vm609_vm1 = vsmask.f32 (!%p513_p2), 2304  ;;  %s4334_s0 = sld [smem:[#allocation3_spill]] (!%p513_p2) }
   0x9   : > { %516 = sbr.rel (%p513_p2) target bundleno = 3190 (0xc76), region = 92  ;;  %vm603_vm2 = vcmask (!%p513_p2), 1040384   ;;  %s4335_s26 = sld [smem:[#allocation2_spill]] (!%p513_p2)  ;;  %vm608_vm3 = vcmask (!%p513_p2), 1042432   ;;  %v3447_v40 = vmov (!%p513_p2), 0.0   ;;  %vm631_vm6 = vcmask (!%p513_p2), 523264  }
   0xa   : > { %vm3578_vm4 = vmand (!%p513_p2), %vm603_vm2, %vm604_vm0  ;;  %s3446_s1 = smov (!%p513_p2), 64   ;;  %3091 = vmatprep.subr.bf16.mxu0 (!%p513_p2), %v3447_v40  ;;  %vm3448_vm7 = vmmov (!%p513_p2), 0   ;;  %s4340_s21 = sld [smem:[#allocation4_spill]] (!%p513_p2)  ;;  %vm1790_vm8 = vcmask (!%p513_p2), 781824   ;;  %vm1764_vm9 = vcmask (!%p513_p2), 519424   ;;  %vm1816_vm10 = vcmask (!%p513_p2), 1044224  }
   0xb   : > { %vm3589_vm5 = vmand (!%p513_p2), %vm608_vm3, %vm609_vm1  ;;  %3099 = vmatprep.mubr.msk.bf16.mxu0 (!%p513_p2), %vm3448_vm7, %v3447_v40  ;;  %vm1738_vm11 = vcmask (!%p513_p2), 257024   ;;  %v3409_v10 = vld [vmem:[%s4324_s13 + $0x110] ss:$8 sps:$4 sm:$0xff] (!%p513_p2)   ;;  %v3414_v16 = vld [vmem:[%s4324_s13 + $0x124] ss:$8 sps:$4 sm:$0xff] (!%p513_p2)  }
   0xe   : > { %v3254_v0 = vld [vmem:[%s4334_s0 + $0x40] sm:$0xff] (!%p513_p2)   ;;  %v3256_v2 = vld [vmem:[%s4334_s0 + $0x48] sm:$0xff] (!%p513_p2)   ;;  %v3258_v8 = vld [vmem:[%s4334_s0 + $0x50] sm:$0xff] (!%p513_p2)  }
   0xf   : > { %v3255_v1 = vld [vmem:[%s4334_s0] sm:$0xff] (!%p513_p2)   ;;  %2976 = vmatprep.subr.bf16.mxu1 (!%p513_p2), %v3254_v0  ;;  %v3257_v3 = vld [vmem:[%s4334_s0 + $0x8] sm:$0xff] (!%p513_p2)   ;;  %v3259_v13 = vld [vmem:[%s4334_s0 + $0x10] sm:$0xff] (!%p513_p2)  }
  0x10   : > { %s4342_s28 = smov (!%p566_p3, %s2792_s28), 1  ;;  %2977 = vmatpush3.bf16.msra.mxu1 %v3255_v1  ;;  %v3260_v14 = vld [vmem:[%s4334_s0 + $0x58] sm:$0xff]   ;;  %v3262_v22 = vld [vmem:[%s4334_s0 + $0x60] sm:$0xff]   ;;  %v3264_v31 = vld [vmem:[%s4334_s0 + $0x68] sm:$0xff]  }
  0x11   : > { %s2974_s20 = sshll.u32 %s4342_s28, 2  ;;  %2978 = vmatprep.subr.bf16.mxu1 %v3256_v2  ;;  %v3261_v20 = vld [vmem:[%s4334_s0 + $0x18] sm:$0xff]   ;;  %v3263_v27 = vld [vmem:[%s4334_s0 + $0x20] sm:$0xff]   ;;  %v3265_v35 = vld [vmem:[%s4334_s0 + $0x28] sm:$0xff]  }
  0x12   : > { %s570_s29 = scalar_lea.vmem %s4335_s26, %s2974_s20  ;;  %v3266_v36 = vld [vmem:[%s4334_s0 + $0x70] sm:$0xff]   ;;  %v3268_v38 = vld [vmem:[%s4334_s0 + $0x78] sm:$0xff]   ;;  %v3270_v41 = vld [vmem:[%s4334_s0 + $0xc0] sm:$0xff]   ;;  %s3451_s26 = smov 32  }
  0x13   : > { %v2801_v4 = vld.sshfl [vmem:[%s570_s29] sm:$0x33 pattern:$0x76325410]  ;;  %v3267_v37 = vld [vmem:[%s4334_s0 + $0x30] sm:$0xff]   ;;  %v3269_v39 = vld [vmem:[%s4334_s0 + $0x38] sm:$0xff]  }
  0x14   : > { %v588_v5 = vshrl.u32 %v2801_v4, 16  ;;  %v591_v6 = vshll.u32 %v2801_v4, 16  ;;  %v586_v7 = vcombine.high %v2801_v4, %v2801_v4  ;;  %2979 = vmatpush3.bf16.msra.mxu1 %v3257_v3  ;;  %v3280_v42 = vld [vmem:[%s4334_s0 + $0x100] sm:$0xff]   ;;  %v3283_v43 = vld [vmem:[%s4334_s0 + $0x108] sm:$0xff]   ;;  %v3286_v44 = vld [vmem:[%s4334_s0 + $0x110] sm:$0xff]  }
  0x15   : > { %2980 = vmatprep.subr.bf16.mxu1 %v3258_v8  ;;  %3092 = vmatpush3.bf16.msra.mxu0 %v3280_v42  ;;  %v3289_v45 = vld [vmem:[%s4334_s0 + $0x118] sm:$0xff]   ;;  %v3271_v48 = vld [vmem:[%s4334_s0 + $0x80] sm:$0xff]   ;;  %v3272_v51 = vld [vmem:[%s4334_s0 + $0xc8] sm:$0xff]  }
  0x16   : > { %v590_v9 = vrot.slane %v588_v5, 7  ;;  %v595_v11 = vshrl.u32 %v586_v7, 16  ;;  %v598_v12 = vshll.u32 %v586_v7, 16  ;;  %3093 = vmatprep.subr.bf16.mxu0 %v3447_v40  ;;  %v3273_v52 = vld [vmem:[%s4334_s0 + $0x88] sm:$0xff]   ;;  %v3274_v53 = vld [vmem:[%s4334_s0 + $0xd0] sm:$0xff]   ;;  %v3276_v55 = vld [vmem:[%s4334_s0 + $0xd8] sm:$0xff]  }
  0x17   : > { %v3275_v54 = vld [vmem:[%s4334_s0 + $0x90] sm:$0xff]   ;;  %v3277_v56 = vld [vmem:[%s4334_s0 + $0x98] sm:$0xff]   ;;  %v3278_v57 = vld [vmem:[%s4334_s0 + $0xe0] sm:$0xff]  }
  0x18   : > { %v593_v15 = vor.u32 %v591_v6, %v590_v9  ;;  %v597_v17 = vrot.slane %v595_v11, 7  ;;  %2981 = vmatpush3.bf16.msra.mxu1 %v3259_v13  ;;  %v3279_v58 = vld [vmem:[%s4334_s0 + $0xa0] sm:$0xff]   ;;  %v3281_v59 = vld [vmem:[%s4334_s0 + $0xe8] sm:$0xff]   ;;  %v3284_v61 = vld [vmem:[%s4334_s0 + $0xf0] sm:$0xff]  }
  0x19   : > { %2982 = vmatprep.subr.bf16.mxu1 %v3260_v14  ;;  %3094 = vmatpush3.bf16.msra.mxu0 %v3283_v43  ;;  %v3282_v60 = vld [vmem:[%s4334_s0 + $0xa8] sm:$0xff]   ;;  %v3285_v62 = vld [vmem:[%s4334_s0 + $0xb0] sm:$0xff]   ;;  %v3287_v63 = vld [vmem:[%s4334_s0 + $0xf8] sm:$0xff]  }
  0x1a   : > { %v606_v18 = vsel %vm3578_vm4, 0, %v593_v15  ;;  %v600_v19 = vor.u32 %v598_v12, %v597_v17  ;;  %3095 = vmatprep.subr.bf16.mxu0 %v3447_v40  ;;  %v3288_v0 = vld [vmem:[%s4334_s0 + $0xb8] sm:$0xff]   ;;  %v3290_v3 = vld [vmem:[%s4314_s3 + $0x80] sm:$0xff]   ;;  %v3294_v6 = vld [vmem:[%s4314_s3 + $0x48] sm:$0xff]  }
  0x1b   : > { %v3600_v21 = vsel %vm3589_vm5, %v606_v18, 0  ;;  %v3291_v4 = vld [vmem:[%s4314_s3 + $0x40] sm:$0xff]   ;;  %v3292_v7 = vld [vmem:[%s4314_s3 + $0x88] sm:$0xff]   ;;  %v3295_v8 = vld [vmem:[%s4314_s3 + $0x90] sm:$0xff]  }
  0x1c   : > { %v614_v23 = vshrl.u32 %v3600_v21, 16  ;;  %v616_v24 = vshll.u32 %v3600_v21, 16  ;;  %v607_v25 = vsel %vm3578_vm4, 0, %v600_v19  ;;  %2983 = vmatpush3.bf16.msra.mxu1 %v3261_v20  ;;  %v636_v49 = vrot.slane %v3600_v21, 1  ;;  %v3293_v5 = vld [vmem:[%s4314_s3] sm:$0xff]   ;;  %v3296_v9 = vld [vmem:[%s4314_s3 + $0x8] sm:$0xff]  }
  0x1d   : > { %v612_v26 = vsel %vm3589_vm5, %v607_v25, 0  ;;  %2984 = vmatprep.subr.bf16.mxu1 %v3262_v22  ;;  %3096 = vmatpush3.bf16.msra.mxu0 %v3286_v44  ;;  %v3297_v11 = vld [vmem:[%s4314_s3 + $0x50] sm:$0xff]   ;;  %v3298_v12 = vld [vmem:[%s4314_s3 + $0x98] sm:$0xff]   ;;  %v3301_v17 = vld [vmem:[%s4314_s3 + $0xa0] sm:$0xff]  }
  0x1e   : > { %v618_v28 = vrot.slane %v616_v24, 1  ;;  %v621_v29 = vshrl.u32 %v612_v26, 16  ;;  %v623_v30 = vshll.u32 %v612_v26, 16  ;;  %3097 = vmatprep.subr.bf16.mxu0 %v3447_v40  ;;  %v637_v46 = vrot.slane %v612_v26, 1  ;;  %v3299_v13 = vld [vmem:[%s4314_s3 + $0x10] sm:$0xff]   ;;  %v3300_v15 = vld [vmem:[%s4314_s3 + $0x58] sm:$0xff]  }
  0x1f   : > { %v3302_v19 = vld [vmem:[%s4314_s3 + $0x18] sm:$0xff]   ;;  %v3303_v22 = vld [vmem:[%s4314_s3 + $0x60] sm:$0xff]   ;;  %v3306_v25 = vld [vmem:[%s4314_s3 + $0x68] sm:$0xff]  }
  0x20   : > { %v619_v32 = vor.u32 %v618_v28, %v614_v23  ;;  %v625_v33 = vrot.slane %v623_v30, 1  ;;  %2985 = vmatpush3.bf16.msra.mxu1 %v3263_v27  ;;  %v3304_v23 = vld [vmem:[%s4314_s3 + $0xa8] sm:$0xff]   ;;  %v3305_v24 = vld [vmem:[%s4314_s3 + $0x20] sm:$0xff]   ;;  %v3309_v28 = vld [vmem:[%s4314_s3 + $0x70] sm:$0xff]  }
  0x21   : > { %2986 = vmatprep.subr.bf16.mxu1 %v3264_v31  ;;  %3098 = vmatpush3.bf16.msra.mxu0 %v3289_v45  ;;  %v3308_v27 = vld [vmem:[%s4314_s3 + $0x28] sm:$0xff]   ;;  %v3311_v30 = vld [vmem:[%s4314_s3 + $0x30] sm:$0xff]   ;;  %v3312_v31 = vld [vmem:[%s4314_s3 + $0x78] sm:$0xff]  }
  0x22   : > { %627 = vrot.lane.b32.xlu0 %v619_v32, %s3446_s1  ;;  %v626_v34 = vor.u32 %v625_v33, %v621_v29  ;;  %3103 = vmatprep.subr.bf16.mxu0 %v3447_v40  ;;  %v3310_v29 = vld [vmem:[%s4314_s3 + $0xb8] sm:$0xff]  }
  0x23   : > { %v3313_v32 = vld [vmem:[%s4314_s3 + $0x38] sm:$0xff]  }
  0x24   : > { %2987 = vmatpush3.bf16.msra.mxu1 %v3265_v35  ;;  %3100 = vmatmul.mubr.msk.bf16.vlgmr.msra.gmra.mrb[0].mxu0 %vm631_vm6, %v637_v46 }
  0x25   : > { %2988 = vmatprep.subr.bf16.mxu1 %v3266_v36  ;;  %3119 = vmatprep.mubr.msk.bf16.mxu0 %vm3448_vm7, %v3447_v40 }
  0x26   : > { %629 = vrot.lane.b32.xlu0 %v626_v34, %s3446_s1  ;;  %3104 = vmatpush3.bf16.msra.mxu0 %v3290_v3  ;;  %v3319_v3 = vld [vmem:[%s4316_s5 + $0x28] sm:$0xff]  }
  0x27   : > { %3105 = vmatprep.subr.bf16.mxu0 %v3447_v40 }
  0x28   : > { %2989 = vmatpush3.bf16.msra.mxu1 %v3267_v37 }
  0x29   : > { %2990 = vmatprep.subr.bf16.mxu1 %v3268_v38  ;;  %v2802_v38 = vld [vmem:[%s4340_s21] ss:$0 sm:$0xff]  ;;  %s3452_s21 = smov 96  }
  0x2a   : > { %3106 = vmatpush3.bf16.msra.mxu0 %v3292_v7  ;;  %v3323_v7 = vld [vmem:[%s4316_s5 + $0x48] sm:$0xff]  }
  0x2b   : > { %3107 = vmatprep.subr.bf16.mxu0 %v3447_v40 }
  0x2c   : > { %2991 = vmatpush3.bf16.msra.mxu1 %v3269_v39 }
  0x2d   : > { %2998 = vmatprep.subr.bf16.mxu1 %v3270_v41 }
  0x2e   : > { %3108 = vmatpush3.bf16.msra.mxu0 %v3295_v8  ;;  %v3324_v8 = vld [vmem:[%s4316_s5 + $0x50] sm:$0xff]  }
  0x2f   : > { %3109 = vmatprep.subr.bf16.mxu0 %v3447_v40 }
  0x32   : > { %3110 = vmatpush3.bf16.msra.mxu0 %v3298_v12 }
  0x33   : > { %3111 = vmatprep.subr.bf16.mxu0 %v3447_v40 }
  0x36   : > { %3112 = vmatpush3.bf16.msra.mxu0 %v3301_v17  ;;  %v2840_v17 = vld [vmem:[%s4315_s4] ss:$0 sm:$0xff] }
  0x37   : > { %3113 = vmatprep.subr.bf16.mxu0 %v3447_v40 }
  0x3a   : > { %3114 = vmatpush3.bf16.msra.mxu0 %v3304_v23 }
  0x3b   : > { %3115 = vmatprep.subr.bf16.mxu0 %v3447_v40 }
  0x94   : > { %v628_v47 = vpop.permute.xlu0 %627 }
  0x95   : > { %v641_v50 = vsel %vm631_vm6, %v612_v26, %v628_v47  ;;  %v3307_v26 = vld [vmem:[%s4314_s3 + $0xb0] sm:$0xff]  }
  0x96   : > { %973 = vmatprep.mubr.bf16.mxu1 %v641_v50  ;;  %3116 = vmatpush3.bf16.msra.mxu0 %v3307_v26 }
  0x97   : > { %974 = vmatmul.mubr.bf16.vlgmr.msra.gmra.mrb[0].mxu1 %v3600_v21  ;;  %3117 = vmatprep.subr.bf16.mxu0 %v3447_v40 }
  0x98   : > { %2999 = vmatpush3.bf16.msra.mxu1 %v3271_v48  ;;  %1013 = vmatprep.mubr.bf16.mxu1 %v636_v49  ;;  %v630_v1 = vpop.permute.xlu0 %629 }
  0x99   : > { %3000 = vmatprep.subr.bf16.mxu1 %v3272_v51  ;;  %v632_v2 = vsel %vm631_vm6, %v628_v47, %v630_v1  ;;  %v3317_v1 = vld [vmem:[%s4316_s5 + $0x18] sm:$0xff]  }
  0x9a   : > { %3118 = vmatpush3.bf16.msra.mxu0 %v3310_v29  ;;  %v3326_v29 = vld [vmem:[%s4318_s7] sm:$0xff]  }
  0x9b   : > { %3123 = vmatprep.subr.bf16.mxu0 %v3447_v40 }
  0x9c   : > { %3001 = vmatpush3.bf16.msra.mxu1 %v3273_v52 }
  0x9d   : > { %3002 = vmatprep.subr.bf16.mxu1 %v3274_v53 }
  0xa0   : > { %3003 = vmatpush3.bf16.msra.mxu1 %v3275_v54 }
  0xa1   : > { %3004 = vmatprep.subr.bf16.mxu1 %v3276_v55 }
  0xa4   : > { %3005 = vmatpush3.bf16.msra.mxu1 %v3277_v56 }
  0xa5   : > { %3006 = vmatprep.subr.bf16.mxu1 %v3278_v57 }
  0xa8   : > { %3007 = vmatpush3.bf16.msra.mxu1 %v3279_v58 }
  0xa9   : > { %3008 = vmatprep.subr.bf16.mxu1 %v3281_v59 }
  0xac   : > { %3009 = vmatpush3.bf16.msra.mxu1 %v3282_v60 }
  0xad   : > { %3010 = vmatprep.subr.bf16.mxu1 %v3284_v61  ;;  %v3314_v61 = vld [vmem:[%s4316_s5] sm:$0xff]  }
  0xb0   : > { %3011 = vmatpush3.bf16.msra.mxu1 %v3285_v62  ;;  %v3449_v62 = vmov 0  }
  0xb1   : > { %3012 = vmatprep.subr.bf16.mxu1 %v3287_v63  ;;  %v3315_v63 = vld [vmem:[%s4316_s5 + $0x8] sm:$0xff]  }
  0xb4   : > { %3013 = vmatpush3.bf16.msra.mxu1 %v3288_v0  ;;  %v3316_v0 = vld [vmem:[%s4316_s5 + $0x10] sm:$0xff]  }
  0xb5   : > { %3025 = vmatprep.subr.bf16.mxu1 %v3291_v4  ;;  %v3320_v4 = vld [vmem:[%s4316_s5 + $0x30] sm:$0xff]  }
  0xb7   : > { %1014 = vmatmul.mubr.bf16.vlgmr.msra.gmra.mrb[4].mxu1 %v632_v2  ;;  %v3318_v2 = vld [vmem:[%s4316_s5 + $0x20] sm:$0xff]  }
  0xb8   : > { %3026 = vmatpush3.bf16.msra.mxu1 %v3293_v5  ;;  %v3321_v5 = vld [vmem:[%s4316_s5 + $0x38] sm:$0xff]  }
  0xb9   : > { %3027 = vmatprep.subr.bf16.mxu1 %v3294_v6  ;;  %v3322_v6 = vld [vmem:[%s4316_s5 + $0x40] sm:$0xff]  }
  0xbc   : > { %3028 = vmatpush3.bf16.msra.mxu1 %v3296_v9  ;;  %v3325_v9 = vld [vmem:[%s4316_s5 + $0x58] sm:$0xff]  }
  0xbd   : > { %3029 = vmatprep.subr.bf16.mxu1 %v3297_v11 }
  0xc0   : > { %3030 = vmatpush3.bf16.msra.mxu1 %v3299_v13 }
  0xc1   : > { %3031 = vmatprep.subr.bf16.mxu1 %v3300_v15 }
  0xc4   : > { %3032 = vmatpush3.bf16.msra.mxu1 %v3302_v19 }
  0xc5   : > { %3033 = vmatprep.subr.bf16.mxu1 %v3303_v22 }
  0xc8   : > { %3034 = vmatpush3.bf16.msra.mxu1 %v3305_v24 }
  0xc9   : > { %3035 = vmatprep.subr.bf16.mxu1 %v3306_v25 }
  0xcc   : > { %3036 = vmatpush3.bf16.msra.mxu1 %v3308_v27 }
  0xcd   : > { %3037 = vmatprep.subr.bf16.mxu1 %v3309_v28 }
  0xd0   : > { %3038 = vmatpush3.bf16.msra.mxu1 %v3311_v30 }
  0xd1   : > { %3039 = vmatprep.subr.bf16.mxu1 %v3312_v31  ;;  %v3327_v31 = vld [vmem:[%s4318_s7 + $0x8] sm:$0xff]  }
  0xd4   : > { %3040 = vmatpush3.bf16.msra.mxu1 %v3313_v32 }
  0xd5   : > { %1495 = vmatprep.subr.bf16.mxu1 %v3449_v62 }
  0xf7   : > { %v1055_v14 = vpop.f32.mrb[0].mxu0 }
  0xf8   : > { %v3101_v18 = vpop.f32.mrb[1].mxu0 }
  0xf9   : > { %v1058_v20 = vpop.f32.mrb[2].mxu0 }
  0xfa   : > { %v3102_v21 = vpop.f32.mrb[3].mxu0 }
 0x16a   : > { %v2992_v33 = vpop.f32.mrb[0].mxu1 }
 0x16b   : > { %v2993_v34 = vpop.f32.mrb[1].mxu1 }
 0x16c   : > { %v2994_v35 = vadd.f32 %v2993_v34, %v2992_v33  ;;  %v2995_v36 = vpop.f32.mrb[2].mxu1 }
 0x16d   : > { %v2996_v37 = vpop.f32.mrb[3].mxu1  ;;  %v3328_v36 = vld [vmem:[%s4318_s7 + $0x10] sm:$0xff]  }
 0x16e   : > { %v976_v42 = vadd.f32 %v2994_v35, %v2802_v38 }
 0x18a   : > { %v3014_v39 = vpop.f32.mrb[4].mxu1 }
 0x18b   : > { %v3015_v41 = vpop.f32.mrb[5].mxu1 }
 0x18c   : > { %v3016_v43 = vadd.f32 %v3015_v41, %v3014_v39  ;;  %v3017_v44 = vpop.f32.mrb[6].mxu1  ;;  %v3329_v41 = vld [vmem:[%s4318_s7 + $0x18] sm:$0xff]  }
 0x18d   : > { %v3018_v45 = vpop.f32.mrb[7].mxu1 }
 0x18e   : > { %v1016_v46 = vadd.f32 %v3016_v43, %v976_v42  ;;  %v3330_v42 = vld [vmem:[%s4318_s7 + $0x20] sm:$0xff]   ;;  %v3331_v43 = vld [vmem:[%s4318_s7 + $0x28] sm:$0xff]  }
 0x190   : > { %v1056_v47 = vadd.f32 %v1055_v14, %v1016_v46  ;;  %v3332_v46 = vld [vmem:[%s4318_s7 + $0x30] sm:$0xff]  }
 0x192   : > { %v1061_v48 = vmax.f32 %v1056_v47, 0.0  ;;  %v3333_v47 = vld [vmem:[%s4318_s7 + $0x38] sm:$0xff]  }
 0x194   : > { %v1062_v49 = vpack.c.bf16 %v1061_v48, %v1061_v48  ;;  %v3450_v48 = vmov 0.0|0.0  }
 0x196   : > { %v1064_v50 = vshrl.u32 %v1062_v49, 16  ;;  %v1067_v52 = vshll.u32 %v1062_v49, 16  ;;  %v2865_v49 = vld [vmem:[%s4317_s6] ss:$0 sm:$0xff] }
 0x198   : > { %v1066_v51 = vrot.slane %v1064_v50, 7 }
 0x19a   : > { %v1069_v53 = vor.u32 %v1067_v52, %v1066_v51 }
 0x19c   : > { %v1071_v54 = vsel %vm3578_vm4, 0, %v1069_v53  ;;  %v1648_v53 = vld [vmem:[%s4326_s15] sm:$0xff] }
 0x19d   : > { %v1072_v55 = vsel %vm3589_vm5, %v1071_v54, 0  ;;  %v1649_v54 = vld [vmem:[%s4326_s15 + $0x8] sm:$0xff] }
 0x19e   : > { %v1082_v56 = vrot.slane %v1072_v55, 1  ;;  %v1076_v57 = vshll.u32 %v1072_v55, 16  ;;  %v1074_v58 = vshrl.u32 %v1072_v55, 16 }
 0x1a0   : > { %3120 = vmatmul.mubr.bf16.vlgmr.msra.gmra.mrb[4].mxu0 %v1082_v56  ;;  %v1078_v59 = vrot.slane %v1076_v57, 1 }
 0x1a1   : > { %3139 = vmatprep.mubr.msk.bf16.mxu0 %vm3448_vm7, %v3447_v40  ;;  %3124 = vmatpush3.bf16.msra.mxu0 %v3326_v29 }
 0x1a2   : > { %v1079_v60 = vor.u32 %v1078_v59, %v1074_v58  ;;  %3125 = vmatprep.subr.bf16.mxu0 %v3447_v40  ;;  %v3198_v58 = vpack.c.bf16 %v1649_v54, %v1648_v53 }
 0x1a4   : > { %1315 = vmatprep.mubr.bf16.mxu1 %v1079_v60  ;;  %v1650_v60 = vld [vmem:[%s4326_s15 + $0x10] sm:$0xff] }
 0x1a5   : > { %1316 = vmatmul.mubr.bf16.vlgmr.msra.gmra.mrb[8].mxu1 %v1072_v55  ;;  %3126 = vmatpush3.bf16.msra.mxu0 %v3327_v31 }
 0x1a6   : > { %1496 = vmatpush1.bf16.msra.mxu1 %v3314_v61  ;;  %3127 = vmatprep.subr.bf16.mxu0 %v3447_v40  ;;  %v1651_v61 = vld [vmem:[%s4326_s15 + $0x18] sm:$0xff] }
 0x1a7   : > { %1497 = vmatprep.subr.bf16.mxu1 %v3449_v62 }
 0x1a9   : > { %3128 = vmatpush3.bf16.msra.mxu0 %v3328_v36 }
 0x1aa   : > { %1498 = vmatpush1.bf16.msra.mxu1 %v3315_v63  ;;  %3129 = vmatprep.subr.bf16.mxu0 %v3447_v40  ;;  %v3201_v63 = vpack.c.bf16 %v1651_v61, %v1650_v60 }
 0x1ab   : > { %1499 = vmatprep.subr.bf16.mxu1 %v3449_v62 }
 0x1ad   : > { %3130 = vmatpush3.bf16.msra.mxu0 %v3329_v41 }
 0x1ae   : > { %1500 = vmatpush1.bf16.msra.mxu1 %v3316_v0  ;;  %3131 = vmatprep.subr.bf16.mxu0 %v3447_v40  ;;  %v1652_v0 = vld [vmem:[%s4326_s15 + $0x20] sm:$0xff] }
 0x1af   : > { %1501 = vmatprep.subr.bf16.mxu1 %v3449_v62 }
 0x1b1   : > { %3132 = vmatpush3.bf16.msra.mxu0 %v3330_v42 }
 0x1b2   : > { %1502 = vmatpush1.bf16.msra.mxu1 %v3317_v1  ;;  %3133 = vmatprep.subr.bf16.mxu0 %v3447_v40  ;;  %v1653_v1 = vld [vmem:[%s4326_s15 + $0x28] sm:$0xff] }
 0x1b3   : > { %1503 = vmatprep.subr.bf16.mxu1 %v3449_v62 }
 0x1b5   : > { %3134 = vmatpush3.bf16.msra.mxu0 %v3331_v43 }
 0x1b6   : > { %1504 = vmatpush1.bf16.msra.mxu1 %v3318_v2  ;;  %3135 = vmatprep.subr.bf16.mxu0 %v3447_v40  ;;  %v3204_v2 = vpack.c.bf16 %v1653_v1, %v1652_v0 }
 0x1b7   : > { %1505 = vmatprep.subr.bf16.mxu1 %v3449_v62 }
 0x1b9   : > { %3136 = vmatpush3.bf16.msra.mxu0 %v3332_v46 }
 0x1ba   : > { %1506 = vmatpush1.bf16.msra.mxu1 %v3319_v3  ;;  %3137 = vmatprep.subr.bf16.mxu0 %v3447_v40  ;;  %v1654_v3 = vld [vmem:[%s4326_s15 + $0x30] sm:$0xff] }
 0x1bb   : > { %1507 = vmatprep.subr.bf16.mxu1 %v3449_v62 }
 0x1bd   : > { %3138 = vmatpush3.bf16.msra.mxu0 %v3333_v47 }
 0x1be   : > { %1508 = vmatpush1.bf16.msra.mxu1 %v3320_v4  ;;  %3197 = vmatprep.subr.bf16.mxu0 %v3450_v48  ;;  %v1655_v4 = vld [vmem:[%s4326_s15 + $0x38] sm:$0xff] }
 0x1bf   : > { %1509 = vmatprep.subr.bf16.mxu1 %v3449_v62 }
 0x1c2   : > { %1510 = vmatpush1.bf16.msra.mxu1 %v3321_v5  ;;  %v3207_v5 = vpack.c.bf16 %v1655_v4, %v1654_v3  ;;  %v1859_v3 = vld [vmem:[%s4328_s17] sm:$0xff]  ;;  %v1860_v4 = vld [vmem:[%s4328_s17 + $0x8] sm:$0xff] }
 0x1c3   : > { %1511 = vmatprep.subr.bf16.mxu1 %v3449_v62 }
 0x1c6   : > { %1512 = vmatpush1.bf16.msra.mxu1 %v3322_v6  ;;  %v1742_v6 = vlaneseq }
 0x1c7   : > { %1513 = vmatprep.subr.bf16.mxu1 %v3449_v62 }
 0x1ca   : > { %1514 = vmatpush1.bf16.msra.mxu1 %v3323_v7  ;;  %v3924_v7 = vand.u32 127, %v1742_v6 }
 0x1cb   : > { %1515 = vmatprep.subr.bf16.mxu1 %v3449_v62 }
 0x1ce   : > { %1516 = vmatpush1.bf16.msra.mxu1 %v3324_v8  ;;  %v2879_v8 = vld [vmem:[%s4319_s8] ss:$0 sm:$0xff] }
 0x1cf   : > { %1517 = vmatprep.subr.bf16.mxu1 %v3449_v62 }
 0x1d2   : > { %1518 = vmatpush1.bf16.msra.mxu1 %v3325_v9 }
 0x1d3   : > { %3209 = vmatprep.subr.bf16.mxu1 %v3450_v48 }
 0x273   : > { %v1357_v11 = vpop.f32.mrb[4].mxu0 }
 0x274   : > { %v3121_v12 = vpop.f32.mrb[5].mxu0 }
 0x275   : > { %v1360_v13 = vpop.f32.mrb[6].mxu0 }
 0x276   : > { %v3122_v14 = vpop.f32.mrb[7].mxu0 }
 0x278   : > { %v3041_v15 = vpop.f32.mrb[8].mxu1 }
 0x279   : > { %v3042_v18 = vpop.f32.mrb[9].mxu1 }
 0x27a   : > { %v3043_v19 = vadd.f32 %v3042_v18, %v3041_v15  ;;  %v3044_v20 = vpop.f32.mrb[10].mxu1 }
 0x27b   : > { %v3045_v21 = vpop.f32.mrb[11].mxu1 }
 0x27c   : > { %v1318_v22 = vadd.f32 %v3043_v19, %v2840_v17  ;;  %v2889_v17 = vld [vmem:[%s4327_s16] ss:$0 sm:$0xff] }
 0x27e   : > { %v1358_v23 = vadd.f32 %v1357_v11, %v1318_v22 }
 0x280   : > { %v1363_v24 = vmax.f32 %v1358_v23, 0.0 }
 0x282   : > { %v1364_v25 = vpack.c.bf16 %v1363_v24, %v1363_v24 }
 0x284   : > { %v1366_v26 = vshrl.u32 %v1364_v25, 16  ;;  %v1369_v28 = vshll.u32 %v1364_v25, 16 }
 0x286   : > { %v1368_v27 = vrot.slane %v1366_v26, 7 }
 0x288   : > { %v1371_v30 = vor.u32 %v1369_v28, %v1368_v27 }
 0x28a   : > { %v1373_v32 = vsel %vm3578_vm4, 0, %v1371_v30 }
 0x28b   : > { %v1374_v33 = vsel %vm3589_vm5, %v1373_v32, 0 }
 0x28c   : > { %v1385_v34 = vrot.slane %v1374_v33, 1  ;;  %v1378_v35 = vshll.u32 %v1374_v33, 16  ;;  %v1376_v37 = vshrl.u32 %v1374_v33, 16 }
 0x28e   : > { %2878 = vmatprep.mubr.msk.bf16.mxu1 %vm631_vm6, %v1385_v34  ;;  %v1380_v38 = vrot.slane %v1378_v35, 1 }
 0x290   : > { %v1381_v39 = vor.u32 %v1380_v38, %v1376_v37 }
 0x292   : > { %1382 = vrot.lane.b32.xlu1 %v1381_v39, %s3446_s1 }
 0x296   : > { %1769 = vrot.lane.b32.xlu1 %v3924_v7, %s3451_s26 }
 0x304   : > { %v1383_v44 = vpop.permute.xlu1 %1382 }
 0x305   : > { %v1387_v45 = vsel %vm631_vm6, %v1374_v33, %v1383_v44 }
 0x306   : > { %1528 = vmatmul.mubr.bf16.vlgmr.msra.gmra.mrb[12].mxu1 %v1387_v45 }
 0x307   : > { %3194 = vmatprep.mubr.msk.f32.mxu1 %vm3448_vm7, %v3447_v40 }
 0x308   : > { %v1770_v25 = vpop.permute.xlu1 %1769 }
 0x3d9   : > { %v1529_v50 = vpop.f32.mrb[12].mxu1 }
 0x3da   : > { %v1530_v51 = vadd.f32 %v2865_v49, %v1529_v50  ;;  %v1531_v52 = vpop.f32.mrb[13].mxu1 }
 0x3db   : > { %v1532_v55 = vpop.f32.mrb[14].mxu1 }
 0x3dc   : > { %v1535_v56 = vmax.f32 %v1530_v51, 0.0  ;;  %v1533_v57 = vpop.f32.mrb[15].mxu1 }
 0x3de   : > { %v1536_v59 = vpack.c.bf16 %v1535_v56, %v1535_v56 }
 0x3e0   : > { %3140 = vmatmul.mubr.bf16.vlgmr.msra.gmra.mrb[8].mxu0 %v1536_v59 }
 0x3e1   : > { %3199 = vmatpush3.bf16.msra.mxu0 %v3198_v58  ;;  %3159 = vmatprep.mubr.msk.f32.mxu0 %vm3448_vm7, %v3447_v40 }
 0x3e2   : > { %3200 = vmatprep.subr.bf16.mxu0 %v3450_v48 }
 0x3e5   : > { %3202 = vmatpush3.bf16.msra.mxu0 %v3201_v63 }
 0x3e6   : > { %3203 = vmatprep.subr.bf16.mxu0 %v3450_v48 }
 0x3e9   : > { %3205 = vmatpush3.bf16.msra.mxu0 %v3204_v2 }
 0x3ea   : > { %3206 = vmatprep.subr.bf16.mxu0 %v3450_v48 }
 0x3ed   : > { %3208 = vmatpush3.bf16.msra.mxu0 %v3207_v5  ;;  %v1861_v5 = vld [vmem:[%s4328_s17 + $0x10] sm:$0xff] }
 0x3ee   : > { %2090 = vmatprep.subr.bf16.mxu0 %v3449_v62 }
 0x4b3   : > { %v1642_v9 = vpop.f32.mrb[8].mxu0 }
 0x4b4   : > { %v3931_v11 = vadd.f32 %v2879_v8, %v1642_v9  ;;  %v3141_v12 = vpop.f32.mrb[9].mxu0  ;;  %v3210_v8 = vpack.c.bf16 %v1860_v4, %v1859_v3  ;;  %v1862_v9 = vld [vmem:[%s4328_s17 + $0x18] sm:$0xff]  ;;  %v3338_v3 = vld [vmem:[%s4320_s9 + $0x20] sm:$0xff]   ;;  %v3339_v4 = vld [vmem:[%s4320_s9 + $0x28] sm:$0xff]  }
 0x4b5   : > { %v1645_v13 = vpop.f32.mrb[10].mxu0  ;;  %v3213_v12 = vpack.c.bf16 %v1862_v9, %v1861_v5  ;;  %v3340_v5 = vld [vmem:[%s4320_s9 + $0x30] sm:$0xff]   ;;  %v3342_v9 = vld [vmem:[%s4320_s9 + $0x40] sm:$0xff]  }
 0x4b6   : > { %v3142_v14 = vpop.f32.mrb[11].mxu0  ;;  %3160 = vmatmul.mubr.msk.f32.vlgmr.msra.gmra.mrb[12].mxu0 %vm631_vm6, %v3931_v11  ;;  %3211 = vmatpush3.bf16.msra.mxu1 %v3210_v8  ;;  %v1863_v13 = vld [vmem:[%s4328_s17 + $0x20] sm:$0xff]  ;;  %v3341_v8 = vld [vmem:[%s4320_s9 + $0x38] sm:$0xff]  }
 0x4b7   : > { %3212 = vmatprep.subr.bf16.mxu1 %v3450_v48  ;;  %v1864_v14 = vld [vmem:[%s4328_s17 + $0x28] sm:$0xff] }
 0x4ba   : > { %3214 = vmatpush3.bf16.msra.mxu1 %v3213_v12  ;;  %v3343_v12 = vld [vmem:[%s4320_s9 + $0x48] sm:$0xff]  }
 0x4bb   : > { %3215 = vmatprep.subr.bf16.mxu1 %v3450_v48 }
 0x589   : > { %v1725_v15 = vpop.f32.mrb[12].mxu0 }
 0x58a   : > { %v1730_v18 = vmul.f32 2.0, %v1725_v15  ;;  %v3161_v19 = vpop.f32.mrb[13].mxu0  ;;  %v3216_v15 = vpack.c.bf16 %v1864_v14, %v1863_v13  ;;  %v3344_v13 = vld [vmem:[%s4320_s9 + $0x50] sm:$0xff]   ;;  %v3345_v14 = vld [vmem:[%s4320_s9 + $0x58] sm:$0xff]  }
 0x58c   : > { %v1737_v20 = vsub.f32 %v2889_v17, %v1730_v18  ;;  %v1865_v17 = vld [vmem:[%s4328_s17 + $0x30] sm:$0xff]  ;;  %v1866_v18 = vld [vmem:[%s4328_s17 + $0x38] sm:$0xff]  ;;  %3217 = vmatpush3.bf16.msra.mxu1 %v3216_v15 }
 0x58d   : > { %v3219_v19 = vpack.c.bf16 %v1866_v18, %v1865_v17  ;;  %3218 = vmatprep.subr.bf16.mxu1 %v3450_v48 }
 0x58e   : > { %v1791_v21 = vsel %vm1790_vm8, %v1737_v20, inf  ;;  %v1765_v22 = vsel %vm1764_vm9, %v1737_v20, inf  ;;  %v1817_v23 = vsel %vm1816_vm10, %v1737_v20, inf  ;;  %v1739_v24 = vsel %vm1738_vm11, %v1737_v20, inf }
 0x58f   : > { %1792 = vmin.xlane.f32.xlu0 %v1791_v21  ;;  %1766 = vmin.xlane.f32.xlu1 %v1765_v22  ;;  %v1868_v21 = vld [vmem:[%s4328_s17 + $0x48] sm:$0xff] }
 0x590   : > { %3220 = vmatpush3.bf16.msra.mxu1 %v3219_v19 }
 0x591   : > { %3221 = vmatprep.subr.bf16.mxu1 %v3450_v48 }
 0x593   : > { %1818 = vmin.xlane.f32.xlu0 %v1817_v23  ;;  %v1869_v23 = vld [vmem:[%s4328_s17 + $0x50] sm:$0xff] }
 0x5a0   : > { %1821 = vrot.lane.b32.xlu1 %v3924_v7, %s3452_s21 }
 0x5a9   : > { %1795 = vrot.lane.b32.xlu0 %v3924_v7, %s3446_s1 }
 0x5c4   : > { %1740 = vmin.xlane.f32.xlu1 %v1739_v24  ;;  %v1870_v24 = vld [vmem:[%s4328_s17 + $0x58] sm:$0xff] }
 0x61c   : > { %v1793_v26 = vpop.xlane.xlu0 %1792  ;;  %v1767_v27 = vpop.xlane.xlu1 %1766 }
 0x61d   : > { %vm1768_vm12 = vcmp.eq.f32.partialorder %v1737_v20, %v1767_v27  ;;  %vm1794_vm14 = vcmp.eq.f32.partialorder %v1737_v20, %v1793_v26  ;;  %v1871_v26 = vld [vmem:[%s4328_s17 + $0x60] sm:$0xff]  ;;  %v1872_v27 = vld [vmem:[%s4328_s17 + $0x68] sm:$0xff] }
 0x61e   : > { %v1771_v28 = vsel %vm1768_vm12, %v1770_v25, 32  ;;  %v3225_v25 = vpack.c.bf16 %v1870_v24, %v1869_v23  ;;  %vm1857_vm12 = vcmask 785408  }
 0x61f   : > { %v1772_v29 = vsel %vm1764_vm9, %v1771_v28, 2147483647  ;;  %v3228_v28 = vpack.c.bf16 %v1872_v27, %v1871_v26 }
 0x620   : > { %v1819_v30 = vpop.xlane.xlu0 %1818  ;;  %v1822_v31 = vpop.permute.xlu1 %1821  ;;  %v1774_v32 = vshra.s32 %v1772_v29, 16  ;;  %v1773_v50 = vand.u32 65535, %v1772_v29 }
 0x621   : > { %vm1820_vm13 = vcmp.eq.f32.partialorder %v1737_v20, %v1819_v30  ;;  %v1873_v30 = vld [vmem:[%s4328_s17 + $0x70] sm:$0xff] }
 0x622   : > { %v1823_v33 = vsel %vm1820_vm13, %v1822_v31, 32  ;;  %v1776_v34 = vcvt.s32.f32 %v1774_v32  ;;  %v1775_v53 = vcvt.s32.f32 %v1773_v50  ;;  %v1874_v31 = vld [vmem:[%s4328_s17 + $0x78] sm:$0xff]  ;;  %vm1947_vm13 = vcmask 519168  }
 0x623   : > { %v1824_v35 = vsel %vm1816_vm10, %v1823_v33, 2147483647  ;;  %v3231_v32 = vpack.c.bf16 %v1874_v31, %v1873_v30 }
 0x624   : > { %v1796_v36 = vpop.permute.xlu0 %1795  ;;  %1777 = vmin.xlane.f32.xlu0 %v1776_v34  ;;  %v1826_v37 = vshra.s32 %v1824_v35, 16  ;;  %v1825_v51 = vand.u32 65535, %v1824_v35 }
 0x625   : > { %v1797_v38 = vsel %vm1794_vm14, %v1796_v36, 32 }
 0x626   : > { %v1798_v39 = vsel %vm1790_vm8, %v1797_v38, 2147483647  ;;  %v1828_v41 = vcvt.s32.f32 %v1826_v37  ;;  %v1827_v57 = vcvt.s32.f32 %v1825_v51 }
 0x627   : > { %v1800_v42 = vshra.s32 %v1798_v39, 16  ;;  %v1799_v55 = vand.u32 65535, %v1798_v39 }
 0x628   : > { %1829 = vmin.xlane.f32.xlu1 %v1828_v41 }
 0x629   : > { %v1802_v43 = vcvt.s32.f32 %v1800_v42  ;;  %v1801_v60 = vcvt.s32.f32 %v1799_v55 }
 0x62b   : > { %1803 = vmin.xlane.f32.xlu0 %v1802_v43 }
 0x651   : > { %v1741_v44 = vpop.xlane.xlu1 %1740 }
 0x652   : > { %vm1744_vm15 = vcmp.eq.f32.partialorder %v1737_v20, %v1741_v44  ;;  %v1867_v20 = vld [vmem:[%s4328_s17 + $0x40] sm:$0xff] }
 0x653   : > { %v1745_v45 = vsel %vm1744_vm15, %v3924_v7, 32  ;;  %v3222_v22 = vpack.c.bf16 %v1868_v21, %v1867_v20 }
 0x654   : > { %v1746_v46 = vsel %vm1738_vm11, %v1745_v45, 2147483647  ;;  %vm1854_vm11 = vcmask 261120  }
 0x655   : > { %v1748_v47 = vshra.s32 %v1746_v46, 16  ;;  %v1747_v63 = vand.u32 65535, %v1746_v46  ;;  %3223 = vmatpush3.bf16.msra.mxu1 %v3222_v22 }
 0x656   : > { %3224 = vmatprep.subr.bf16.mxu1 %v3450_v48 }
 0x657   : > { %v1750_v49 = vcvt.s32.f32 %v1748_v47  ;;  %v1749_v1 = vcvt.s32.f32 %v1747_v63 }
 0x659   : > { %1751 = vmin.xlane.f32.xlu0 %v1750_v49  ;;  %3226 = vmatpush3.bf16.msra.mxu1 %v3225_v25 }
 0x65a   : > { %3227 = vmatprep.subr.bf16.mxu1 %v3450_v48 }
 0x65d   : > { %3229 = vmatpush3.bf16.msra.mxu1 %v3228_v28 }
 0x65e   : > { %3230 = vmatprep.subr.bf16.mxu1 %v3450_v48 }
 0x661   : > { %3232 = vmatpush3.bf16.msra.mxu1 %v3231_v32 }
 0x662   : > { %2262 = vmatprep.subr.bf16.mxu1 %v3449_v62 }
 0x6b1   : > { %v3951_v52 = vpop.xlane.xlu0 %1777 }
 0x6b2   : > { %vm1779_vm0 = vcmp.eq.f32.partialorder %v1776_v34, %v3951_v52  ;;  %v1784_v29 = vcvt.f32.s32 %v3951_v52 }
 0x6b3   : > { %v1780_v54 = vsel %vm1779_vm0, %v1775_v53, inf }
 0x6b4   : > { %1781 = vmin.xlane.f32.xlu1 %v1780_v54  ;;  %v1785_v34 = vshll.u32 %v1784_v29, 16 }
 0x6b5   : > { %v3954_v56 = vpop.xlane.xlu1 %1829 }
 0x6b6   : > { %vm1831_vm1 = vcmp.eq.f32.partialorder %v1828_v41, %v3954_v56  ;;  %v1836_v35 = vcvt.f32.s32 %v3954_v56 }
 0x6b7   : > { %v1832_v58 = vsel %vm1831_vm1, %v1827_v57, inf }
 0x6b8   : > { %v3957_v59 = vpop.xlane.xlu0 %1803  ;;  %1833 = vmin.xlane.f32.xlu1 %v1832_v58  ;;  %v1837_v39 = vshll.u32 %v1836_v35, 16  ;;  %v3346_v35 = vld [vmem:[%s4322_s11] sm:$0xff]  }
 0x6b9   : > { %vm1805_vm2 = vcmp.eq.f32.partialorder %v1802_v43, %v3957_v59  ;;  %v1810_v48 = vcvt.f32.s32 %v3957_v59 }
 0x6ba   : > { %v1806_v61 = vsel %vm1805_vm2, %v1801_v60, inf }
 0x6bb   : > { %1807 = vmin.xlane.f32.xlu0 %v1806_v61  ;;  %v1811_v45 = vshll.u32 %v1810_v48, 16  ;;  %v3350_v48 = vld [vmem:[%s4322_s11 + $0x20] sm:$0xff]  }
 0x6e6   : > { %v3960_v0 = vpop.xlane.xlu0 %1751 }
 0x6e7   : > { %vm1753_vm3 = vcmp.eq.f32.partialorder %v1750_v49, %v3960_v0  ;;  %v1758_v52 = vcvt.f32.s32 %v3960_v0  ;;  %v3334_v0 = vld [vmem:[%s4320_s9] sm:$0xff]  }
 0x6e8   : > { %v1754_v2 = vsel %vm1753_vm3, %v1749_v1, inf  ;;  %2091 = vmatpush1.bf16.msra.mxu0 %v3334_v0  ;;  %v3335_v1 = vld [vmem:[%s4320_s9 + $0x8] sm:$0xff]  }
 0x6e9   : > { %1755 = vmin.xlane.f32.xlu0 %v1754_v2  ;;  %v1759_v54 = vshll.u32 %v1758_v52, 16  ;;  %2092 = vmatprep.subr.bf16.mxu0 %v3449_v62  ;;  %v3337_v2 = vld [vmem:[%s4320_s9 + $0x18] sm:$0xff]  }
 0x6ec   : > { %2093 = vmatpush1.bf16.msra.mxu0 %v3335_v1  ;;  %v3366_v1 = vld [vmem:[%s4324_s13 + $0x24] ss:$8 sps:$4 sm:$0xff]  }
 0x6ed   : > { %2094 = vmatprep.subr.bf16.mxu0 %v3449_v62 }
 0x741   : > { %v1782_v33 = vpop.xlane.xlu1 %1781 }
 0x742   : > { %v1783_v36 = vcvt.f32.s32 %v1782_v33 }
 0x744   : > { %v1786_v37 = vadd.s32 %v1785_v34, %v1783_v36  ;;  %v3347_v36 = vld [vmem:[%s4322_s11 + $0x8] sm:$0xff]  }
 0x745   : > { %v1834_v38 = vpop.xlane.xlu1 %1833 }
 0x746   : > { %v1835_v41 = vcvt.f32.s32 %v1834_v38  ;;  %vm1787_vm7 = vcmp.eq.s32.totalorder %v3924_v7, %v1786_v37  ;;  %v3349_v37 = vld [vmem:[%s4322_s11 + $0x18] sm:$0xff]   ;;  %v3351_v38 = vld [vmem:[%s4322_s11 + $0x28] sm:$0xff]  }
 0x747   : > { %v2891_v42 = vsel %vm1787_vm7, 1.0, %v3447_v40 }
 0x748   : > { %v1838_v43 = vadd.s32 %v1837_v39, %v1835_v41  ;;  %v1808_v44 = vpop.xlane.xlu0 %1807  ;;  %1843 = vrot.lane.b32.xlu1 %v2891_v42, %s3451_s26  ;;  %v3352_v39 = vld [vmem:[%s4322_s11 + $0x30] sm:$0xff]   ;;  %v3353_v41 = vld [vmem:[%s4322_s11 + $0x38] sm:$0xff]   ;;  %v3354_v42 = vld [vmem:[%s4322_s11 + $0x40] sm:$0xff]   ;;  %s2975_s26 = sshll.u32 %s4342_s28, 3 }
 0x749   : > { %v1809_v46 = vcvt.f32.s32 %v1808_v44  ;;  %v3356_v44 = vld [vmem:[%s4322_s11 + $0x50] sm:$0xff]   ;;  %s575_s30 = scalar_lea.vmem %s4329_s18, %s2975_s26 }
 0x74a   : > { %vm1839_vm8 = vcmp.eq.s32.totalorder %v3924_v7, %v1838_v43  ;;  %v3355_v43 = vld [vmem:[%s4322_s11 + $0x48] sm:$0xff]  }
 0x74b   : > { %v1812_v47 = vadd.s32 %v1811_v45, %v1809_v46  ;;  %v2893_v49 = vsel %vm1839_vm8, 1.0, %v3447_v40  ;;  %v3357_v45 = vld [vmem:[%s4322_s11 + $0x58] sm:$0xff]   ;;  %v2894_v46 = vld [vmem:[%s4321_s10] ss:$0 sm:$0xff] }
 0x74c   : > { %1851 = vrot.lane.b32.xlu1 %v2893_v49, %s3452_s21 }
 0x74d   : > { %vm1813_vm9 = vcmp.eq.s32.totalorder %v3924_v7, %v1812_v47 }
 0x74e   : > { %v2892_v50 = vsel %vm1813_vm9, 1.0, %v3447_v40 }
 0x74f   : > { %1847 = vrot.lane.b32.xlu0 %v2892_v50, %s3446_s1 }
 0x776   : > { %v1756_v51 = vpop.xlane.xlu0 %1755 }
 0x777   : > { %v1757_v53 = vcvt.f32.s32 %v1756_v51 }
 0x779   : > { %v1760_v55 = vadd.s32 %v1759_v54, %v1757_v53 }
 0x77b   : > { %vm1761_vm10 = vcmp.eq.s32.totalorder %v3924_v7, %v1760_v55 }
 0x77c   : > { %v2890_v57 = vsel %vm1761_vm10, 1.0, %v3447_v40  ;;  %v3336_v40 = vld [vmem:[%s4320_s9 + $0x10] sm:$0xff]  }
 0x77d   : > { %2095 = vmatpush1.bf16.msra.mxu0 %v3336_v40 }
 0x77e   : > { %2096 = vmatprep.subr.bf16.mxu0 %v3449_v62 }
 0x781   : > { %2097 = vmatpush1.bf16.msra.mxu0 %v3337_v2 }
 0x782   : > { %2098 = vmatprep.subr.bf16.mxu0 %v3449_v62 }
 0x785   : > { %2099 = vmatpush1.bf16.msra.mxu0 %v3338_v3 }
 0x786   : > { %2100 = vmatprep.subr.bf16.mxu0 %v3449_v62 }
 0x789   : > { %2101 = vmatpush1.bf16.msra.mxu0 %v3339_v4  ;;  %v3364_v4 = vld [vmem:[%s4324_s13 + $0x20] ss:$8 sps:$4 sm:$0xff]  }
 0x78a   : > { %2102 = vmatprep.subr.bf16.mxu0 %v3449_v62 }
 0x78d   : > { %2103 = vmatpush1.bf16.msra.mxu0 %v3340_v5 }
 0x78e   : > { %2104 = vmatprep.subr.bf16.mxu0 %v3449_v62 }
 0x791   : > { %2105 = vmatpush1.bf16.msra.mxu0 %v3341_v8 }
 0x792   : > { %2106 = vmatprep.subr.bf16.mxu0 %v3449_v62 }
 0x795   : > { %2107 = vmatpush1.bf16.msra.mxu0 %v3342_v9  ;;  %v3369_v9 = vld [vmem:[%s4324_s13 + $0x34] ss:$8 sps:$4 sm:$0xff]  }
 0x796   : > { %2108 = vmatprep.subr.bf16.mxu0 %v3449_v62 }
 0x799   : > { %2109 = vmatpush1.bf16.msra.mxu0 %v3343_v12 }
 0x79a   : > { %2110 = vmatprep.subr.bf16.mxu0 %v3449_v62 }
 0x79d   : > { %2111 = vmatpush1.bf16.msra.mxu0 %v3344_v13  ;;  %v3367_v13 = vld [vmem:[%s4324_s13 + $0x30] ss:$8 sps:$4 sm:$0xff]  }
 0x79e   : > { %2112 = vmatprep.subr.bf16.mxu0 %v3449_v62 }
 0x7a1   : > { %2113 = vmatpush1.bf16.msra.mxu0 %v3345_v14  ;;  %v3372_v14 = vld [vmem:[%s4324_s13 + $0x44] ss:$8 sps:$4 sm:$0xff]  }
 0x7ba   : > { %v1844_v56 = vpop.permute.xlu1 %1843 }
 0x7bb   : > { %v1855_v58 = vsel %vm1854_vm11, %v2890_v57, %v1844_v56 }
 0x7be   : > { %v1852_v60 = vpop.permute.xlu1 %1851 }
 0x7c1   : > { %v1848_v59 = vpop.permute.xlu0 %1847 }
 0x7c2   : > { %v1856_v61 = vsel %vm631_vm6, %v1855_v58, %v1848_v59  ;;  %v3358_v58 = vld [vmem:[%s4324_s13] ss:$8 sps:$4 sm:$0xff]   ;;  %v3360_v59 = vld [vmem:[%s4324_s13 + $0x4] ss:$8 sps:$4 sm:$0xff]  }
 0x7c3   : > { %v1858_v63 = vsel %vm1857_vm12, %v1856_v61, %v1852_v60  ;;  %v3363_v60 = vld [vmem:[%s4324_s13 + $0x14] ss:$8 sps:$4 sm:$0xff]   ;;  %2625 = vmatprep.subr.bf16.mxu0 %v3360_v59 }
 0x7c4   : > { %3195 = vmatmul.mubr.f32.vlgmr.msra.gmra.mrb[16].mxu1 %v1858_v63  ;;  %v3361_v63 = vld [vmem:[%s4324_s13 + $0x10] ss:$8 sps:$4 sm:$0xff]  }
 0x7c5   : > { %2263 = vmatpush1.bf16.msra.mxu1 %v3346_v35  ;;  %v3399_v35 = vld [vmem:[%s4324_s13 + $0xd4] ss:$8 sps:$4 sm:$0xff]  }
 0x7c6   : > { %2264 = vmatprep.subr.bf16.mxu1 %v3449_v62 }
 0x7c9   : > { %2265 = vmatpush1.bf16.msra.mxu1 %v3347_v36  ;;  %v3397_v36 = vld [vmem:[%s4324_s13 + $0xd0] ss:$8 sps:$4 sm:$0xff]  }
 0x7ca   : > { %2266 = vmatprep.subr.bf16.mxu1 %v3449_v62 }
 0x897   : > { %v1941_v15 = vpop.f32.mrb[16].mxu1 }
 0x898   : > { %v1959_v17 = vpack.c.bf16 %v1941_v15, %v1941_v15  ;;  %v3196_v18 = vpop.f32.mrb[17].mxu1  ;;  %v1945_v30 = vsub.f32 %v1941_v15, %v3931_v11  ;;  %v3348_v11 = vld [vmem:[%s4322_s11 + $0x10] sm:$0xff]   ;;  %v3370_v15 = vld [vmem:[%s4324_s13 + $0x40] ss:$8 sps:$4 sm:$0xff]  }
 0x899   : > { %2267 = vmatpush1.bf16.msra.mxu1 %v3348_v11  ;;  %v3373_v18 = vld [vmem:[%s4324_s13 + $0x50] ss:$8 sps:$4 sm:$0xff]   ;;  %v3402_v11 = vld [vmem:[%s4324_s13 + $0xe4] ss:$8 sps:$4 sm:$0xff]  }
 0x89a   : > { %v1961_v19 = vshrl.u32 %v1959_v17, 16  ;;  %v1964_v21 = vshll.u32 %v1959_v17, 16  ;;  %v1946_v31 = vmul.f32 %v1945_v30, %v1945_v30  ;;  %2268 = vmatprep.subr.bf16.mxu1 %v3449_v62  ;;  %v3375_v17 = vld [vmem:[%s4324_s13 + $0x54] ss:$8 sps:$4 sm:$0xff]  }
 0x89c   : > { %v1963_v20 = vrot.slane %v1961_v19, 7  ;;  %v1948_v32 = vsel %vm1947_vm13, %v1946_v31, 0.0  ;;  %v3378_v19 = vld [vmem:[%s4324_s13 + $0x64] ss:$8 sps:$4 sm:$0xff]   ;;  %v3393_v31 = vld [vmem:[%s4324_s13 + $0xb4] ss:$8 sps:$4 sm:$0xff]  }
 0x89d   : > { %2269 = vmatpush1.bf16.msra.mxu1 %v3349_v37  ;;  %v3400_v37 = vld [vmem:[%s4324_s13 + $0xe0] ss:$8 sps:$4 sm:$0xff]  }
 0x89e   : > { %v1966_v22 = vor.u32 %v1964_v21, %v1963_v20  ;;  %2270 = vmatprep.subr.bf16.mxu1 %v3449_v62  ;;  %v3376_v20 = vld [vmem:[%s4324_s13 + $0x60] ss:$8 sps:$4 sm:$0xff]   ;;  %v3381_v21 = vld [vmem:[%s4324_s13 + $0x74] ss:$8 sps:$4 sm:$0xff]  }
 0x8a0   : > { %v1968_v23 = vsel %vm3578_vm4, 0, %v1966_v22  ;;  %v3379_v22 = vld [vmem:[%s4324_s13 + $0x70] ss:$8 sps:$4 sm:$0xff]  }
 0x8a1   : > { %v1969_v24 = vsel %vm3589_vm5, %v1968_v23, 0  ;;  %2271 = vmatpush1.bf16.msra.mxu1 %v3350_v48  ;;  %v3384_v23 = vld [vmem:[%s4324_s13 + $0x84] ss:$8 sps:$4 sm:$0xff]   ;;  %v3403_v48 = vld [vmem:[%s4324_s13 + $0xf0] ss:$8 sps:$4 sm:$0xff]  }
 0x8a2   : > { %v1980_v25 = vrot.slane %v1969_v24, 1  ;;  %v1973_v26 = vshll.u32 %v1969_v24, 16  ;;  %v1971_v27 = vshrl.u32 %v1969_v24, 16  ;;  %2272 = vmatprep.subr.bf16.mxu1 %v3449_v62 }
 0x8a4   : > { %2907 = vmatprep.mubr.msk.bf16.mxu0 %vm631_vm6, %v1980_v25  ;;  %v1975_v28 = vrot.slane %v1973_v26, 1  ;;  %v3387_v25 = vld [vmem:[%s4324_s13 + $0x94] ss:$8 sps:$4 sm:$0xff]   ;;  %v3385_v26 = vld [vmem:[%s4324_s13 + $0x90] ss:$8 sps:$4 sm:$0xff]  }
 0x8a5   : > { %2273 = vmatpush1.bf16.msra.mxu1 %v3351_v38  ;;  %v3405_v38 = vld [vmem:[%s4324_s13 + $0xf4] ss:$8 sps:$4 sm:$0xff]  }
 0x8a6   : > { %v1976_v29 = vor.u32 %v1975_v28, %v1971_v27  ;;  %2274 = vmatprep.subr.bf16.mxu1 %v3449_v62  ;;  %v3390_v27 = vld [vmem:[%s4324_s13 + $0xa4] ss:$8 sps:$4 sm:$0xff]   ;;  %v3388_v28 = vld [vmem:[%s4324_s13 + $0xa0] ss:$8 sps:$4 sm:$0xff]  }
 0x8a8   : > { %1977 = vrot.lane.b32.xlu1 %v1976_v29, %s3446_s1 }
 0x8a9   : > { %2275 = vmatpush1.bf16.msra.mxu1 %v3352_v39  ;;  %v3408_v39 = vld [vmem:[%s4324_s13 + $0x104] ss:$8 sps:$4 sm:$0xff]  }
 0x8aa   : > { %2276 = vmatprep.subr.bf16.mxu1 %v3449_v62 }
 0x8ad   : > { %2277 = vmatpush1.bf16.msra.mxu1 %v3353_v41  ;;  %v2908_v41 = vld [vmem:[%s4323_s12] ss:$0 sm:$0xff] }
 0x8ae   : > { %2278 = vmatprep.subr.bf16.mxu1 %v3449_v62 }
 0x8b1   : > { %2279 = vmatpush1.bf16.msra.mxu1 %v3354_v42 }
 0x8b2   : > { %2280 = vmatprep.subr.bf16.mxu1 %v3449_v62 }
 0x8b5   : > { %2281 = vmatpush1.bf16.msra.mxu1 %v3355_v43 }
 0x8b6   : > { %2282 = vmatprep.subr.bf16.mxu1 %v3449_v62 }
 0x8b9   : > { %2283 = vmatpush1.bf16.msra.mxu1 %v3356_v44 }
 0x8ba   : > { %2284 = vmatprep.subr.bf16.mxu1 %v3449_v62 }
 0x8bd   : > { %2285 = vmatpush1.bf16.msra.mxu1 %v3357_v45 }
 0x8cc   : > { %1949 = vadd.xlane.f32.xlu1 %v1948_v32  ;;  %v3391_v32 = vld [vmem:[%s4324_s13 + $0xb0] ss:$8 sps:$4 sm:$0xff]  }
 0x91a   : > { %v1978_v33 = vpop.permute.xlu1 %1977 }
 0x91b   : > { %v1982_v34 = vsel %vm631_vm6, %v1969_v24, %v1978_v33  ;;  %v3382_v24 = vld [vmem:[%s4324_s13 + $0x80] ss:$8 sps:$4 sm:$0xff]   ;;  %v3396_v33 = vld [vmem:[%s4324_s13 + $0xc4] ss:$8 sps:$4 sm:$0xff]  }
 0x91c   : > { %2123 = vmatmul.mubr.bf16.vlgmr.msra.gmra.mrb[16].mxu0 %v1982_v34  ;;  %v3394_v34 = vld [vmem:[%s4324_s13 + $0xc0] ss:$8 sps:$4 sm:$0xff]  }
 0x91d   : > { %2626 = vmatpush1.bf16.msra.mxu0 %v3358_v58 }
 0x91e   : > { %2627 = vmatprep.subr.bf16.mxu0 %v3363_v60  ;;  %v3406_v60 = vld [vmem:[%s4324_s13 + $0x100] ss:$8 sps:$4 sm:$0xff]  }
 0x921   : > { %2628 = vmatpush1.bf16.msra.mxu0 %v3361_v63  ;;  %v3412_v63 = vld [vmem:[%s4324_s13 + $0x120] ss:$8 sps:$4 sm:$0xff]  }
 0x922   : > { %2629 = vmatprep.subr.bf16.mxu0 %v3366_v1  ;;  %v3420_v1 = vld [vmem:[%s4324_s13 + $0x144] ss:$8 sps:$4 sm:$0xff]  }
 0x925   : > { %2630 = vmatpush1.bf16.msra.mxu0 %v3364_v4  ;;  %v3426_v4 = vld [vmem:[%s4324_s13 + $0x164] ss:$8 sps:$4 sm:$0xff]  }
 0x926   : > { %2631 = vmatprep.subr.bf16.mxu0 %v3369_v9  ;;  %v3427_v9 = vld [vmem:[%s4324_s13 + $0x170] ss:$8 sps:$4 sm:$0xff]  }
 0x929   : > { %2632 = vmatpush1.bf16.msra.mxu0 %v3367_v13  ;;  %v2376_v13 = vshrl.u32 %v1742_v6, 7 }
 0x92a   : > { %2633 = vmatprep.subr.bf16.mxu0 %v3372_v14 }
 0x92b   : > { %v2377_v14 = vsub.s32 0, %v2376_v13 }
 0x92d   : > { %2634 = vmatpush1.bf16.msra.mxu0 %v3370_v15  ;;  %v2373_v15 = vld [vmem:[%s4325_s14] sm:$0x3] }
 0x92e   : > { %2635 = vmatprep.subr.bf16.mxu0 %v3375_v17  ;;  %v2381_v17 = vsub.s32 1, %v2376_v13 }
 0x931   : > { %2636 = vmatpush1.bf16.msra.mxu0 %v3373_v18  ;;  %v2378_v18 = vrot.slane %v2373_v15, %v2377_v14 }
 0x932   : > { %2637 = vmatprep.subr.bf16.mxu0 %v3378_v19  ;;  %v2382_v19 = vrot.slane %v2373_v15, %v2381_v17 }
 0x935   : > { %2638 = vmatpush1.bf16.msra.mxu0 %v3376_v20 }
 0x936   : > { %2639 = vmatprep.subr.bf16.mxu0 %v3381_v21 }
 0x939   : > { %2640 = vmatpush1.bf16.msra.mxu0 %v3379_v22 }
 0x93a   : > { %2641 = vmatprep.subr.bf16.mxu0 %v3384_v23 }
 0x93d   : > { %2642 = vmatpush1.bf16.msra.mxu0 %v3382_v24 }
 0x93e   : > { %2643 = vmatprep.subr.bf16.mxu0 %v3387_v25 }
 0x941   : > { %2644 = vmatpush1.bf16.msra.mxu0 %v3385_v26 }
 0x942   : > { %2645 = vmatprep.subr.bf16.mxu0 %v3390_v27 }
 0x945   : > { %2646 = vmatpush1.bf16.msra.mxu0 %v3388_v28 }
 0x946   : > { %2647 = vmatprep.subr.bf16.mxu0 %v3393_v31 }
 0x949   : > { %2648 = vmatpush1.bf16.msra.mxu0 %v3391_v32 }
 0x94a   : > { %2649 = vmatprep.subr.bf16.mxu0 %v3396_v33 }
 0x94d   : > { %2650 = vmatpush1.bf16.msra.mxu0 %v3394_v34 }
 0x94e   : > { %2651 = vmatprep.subr.bf16.mxu0 %v3399_v35 }
 0x951   : > { %2652 = vmatpush1.bf16.msra.mxu0 %v3397_v36 }
 0x952   : > { %2653 = vmatprep.subr.bf16.mxu0 %v3402_v11 }
 0x955   : > { %2654 = vmatpush1.bf16.msra.mxu0 %v3400_v37  ;;  %v2719_v37 = vadd.s32 128, %v3924_v7 }
 0x956   : > { %2655 = vmatprep.subr.bf16.mxu0 %v3405_v38 }
 0x959   : > { %2656 = vmatpush1.bf16.msra.mxu0 %v3403_v48  ;;  %v1950_v20 = vpop.xlane.xlu1 %1949 }
 0x95a   : > { %2666 = vmatprep.subr.bf16.mxu0 %v3408_v39 }
 0x9ef   : > { %v2124_v47 = vpop.f32.mrb[16].mxu0 }
 0x9f0   : > { %v2125_v49 = vadd.f32 %v2894_v46, %v2124_v47  ;;  %v2126_v50 = vpop.f32.mrb[17].mxu0 }
 0x9f1   : > { %v2127_v51 = vpop.f32.mrb[18].mxu0 }
 0x9f2   : > { %v2130_v52 = vmax.f32 %v2125_v49, 0.0  ;;  %v2128_v53 = vpop.f32.mrb[19].mxu0 }
 0x9f4   : > { %v2131_v54 = vpack.c.bf16 %v2130_v52, %v2130_v52 }
 0x9f6   : > { %v2133_v55 = vshrl.u32 %v2131_v54, 16  ;;  %v2136_v57 = vshll.u32 %v2131_v54, 16 }
 0x9f8   : > { %v2135_v56 = vrot.slane %v2133_v55, 7 }
 0x9fa   : > { %v2138_v61 = vor.u32 %v2136_v57, %v2135_v56 }
 0x9fc   : > { %v2140_v0 = vsel %vm3578_vm4, 0, %v2138_v61  ;;  %v3411_v61 = vld [vmem:[%s4324_s13 + $0x114] ss:$8 sps:$4 sm:$0xff]  }
 0x9fd   : > { %v2141_v40 = vsel %vm3589_vm5, %v2140_v0, 0  ;;  %v3417_v0 = vld [vmem:[%s4324_s13 + $0x134] ss:$8 sps:$4 sm:$0xff]  }
 0x9fe   : > { %v2152_v2 = vrot.slane %v2141_v40, 1  ;;  %v2145_v3 = vshll.u32 %v2141_v40, 16  ;;  %v2143_v5 = vshrl.u32 %v2141_v40, 16 }
 0xa00   : > { %2921 = vmatprep.mubr.msk.bf16.mxu1 %vm631_vm6, %v2152_v2  ;;  %v2147_v8 = vrot.slane %v2145_v3, 1  ;;  %v3423_v2 = vld [vmem:[%s4324_s13 + $0x154] ss:$8 sps:$4 sm:$0xff]   ;;  %v3421_v3 = vld [vmem:[%s4324_s13 + $0x150] ss:$8 sps:$4 sm:$0xff]  }
 0xa02   : > { %v2148_v12 = vor.u32 %v2147_v8, %v2143_v5  ;;  %v3424_v5 = vld [vmem:[%s4324_s13 + $0x160] ss:$8 sps:$4 sm:$0xff]   ;;  %v3429_v8 = vld [vmem:[%s4324_s13 + $0x174] ss:$8 sps:$4 sm:$0xff]  }
 0xa04   : > { %2149 = vrot.lane.b32.xlu0 %v2148_v12, %s3446_s1 }
 0xa76   : > { %v2150_v29 = vpop.permute.xlu0 %2149 }
 0xa77   : > { %v2154_v30 = vsel %vm631_vm6, %v2141_v40, %v2150_v29  ;;  %v3418_v40 = vld [vmem:[%s4324_s13 + $0x140] ss:$8 sps:$4 sm:$0xff]   ;;  %vm2721_vm6 = vcmp.lt.s32.totalorder %v2719_v37, 192 }
 0xa78   : > { %2295 = vmatmul.mubr.bf16.vlgmr.msra.gmra.mrb[20].mxu1 %v2154_v30 }
 0xb4b   : > { %v2296_v42 = vpop.f32.mrb[20].mxu1 }
 0xb4c   : > { %v2297_v43 = vadd.f32 %v2908_v41, %v2296_v42  ;;  %v2298_v44 = vpop.f32.mrb[21].mxu1 }
 0xb4d   : > { %v2299_v45 = vpop.f32.mrb[22].mxu1 }
 0xb4e   : > { %v2302_v46 = vmax.f32 %v2297_v43, 0.0  ;;  %v2300_v47 = vpop.f32.mrb[23].mxu1 }
 0xb50   : > { %v2303_v49 = vpack.c.bf16 %v2302_v46, %v2302_v46 }
 0xb52   : > { %v2305_v50 = vshrl.u32 %v2303_v49, 16  ;;  %v2308_v52 = vshll.u32 %v2303_v49, 16 }
 0xb54   : > { %v2307_v51 = vrot.slane %v2305_v50, 7 }
 0xb56   : > { %v2310_v53 = vor.u32 %v2308_v52, %v2307_v51 }
 0xb58   : > { %v2312_v54 = vsel %vm3578_vm4, 0, %v2310_v53  ;;  %vm1951_vm4 = vcmask 1043456  }
 0xb59   : > { %v2313_v55 = vsel %vm3589_vm5, %v2312_v54, 0  ;;  %v1952_v24 = vsel %vm1951_vm4, %v1950_v20, 0.0  ;;  %vm2723_vm5 = vcmp.eq.s32.totalorder %v2719_v37, 192 }
 0xb5a   : > { %v2317_v56 = vshll.u32 %v2313_v55, 16  ;;  %v2315_v57 = vshrl.u32 %v2313_v55, 16  ;;  %v2323_v12 = vrot.slane %v2313_v55, 1  ;;  %v1953_v6 = vrot.slane %v1952_v24, 4 }
 0xb5c   : > { %v2319_v58 = vrot.slane %v2317_v56, 1  ;;  %v1954_v30 = vadd.f32 %v1953_v6, %v1952_v24 }
 0xb5e   : > { %v2320_v59 = vor.u32 %v2319_v58, %v2315_v57  ;;  %v1955_v31 = vrot.slane %v1954_v30, 2 }
 0xb60   : > { %2657 = vmatprep.mubr.bf16.mxu0 %v2320_v59  ;;  %v1956_v35 = vadd.f32 %v1955_v31, %v1954_v30 }
 0xb61   : > { %2658 = vmatmul.mubr.bf16.vlgmr.msra.gmra.mrb[20].mxu0 %v2313_v55 }
 0xb62   : > { %2667 = vmatpush1.bf16.msra.mxu0 %v3406_v60  ;;  %2698 = vmatprep.mubr.bf16.mxu0 %v3449_v62  ;;  %v3415_v62 = vld [vmem:[%s4324_s13 + $0x130] ss:$8 sps:$4 sm:$0xff]   ;;  %v1957_v11 = vrot.slane %v1956_v35, 1 }
 0xb63   : > { %2668 = vmatprep.subr.bf16.mxu0 %v3411_v61 }
 0xb64   : > { %v1958_v48 = vadd.f32 %v1957_v11, %v1956_v35 }
 0xb66   : > { %2669 = vmatpush1.bf16.msra.mxu0 %v3409_v10  ;;  %v2725_v39 = vsel %vm2723_vm5, %v1958_v48, 0.0 }
 0xb67   : > { %2670 = vmatprep.subr.bf16.mxu0 %v3414_v16 }
 0xb6a   : > { %2671 = vmatpush1.bf16.msra.mxu0 %v3412_v63 }
 0xb6b   : > { %2672 = vmatprep.subr.bf16.mxu0 %v3417_v0 }
 0xb6e   : > { %2673 = vmatpush1.bf16.msra.mxu0 %v3415_v62 }
 0xb6f   : > { %2674 = vmatprep.subr.bf16.mxu0 %v3420_v1 }
 0xb72   : > { %2675 = vmatpush1.bf16.msra.mxu0 %v3418_v40 }
 0xb73   : > { %2676 = vmatprep.subr.bf16.mxu0 %v3423_v2 }
 0xb76   : > { %2677 = vmatpush1.bf16.msra.mxu0 %v3421_v3 }
 0xb77   : > { %2678 = vmatprep.subr.bf16.mxu0 %v3426_v4 }
 0xb7a   : > { %2679 = vmatpush1.bf16.msra.mxu0 %v3424_v5 }
 0xb7b   : > { %2680 = vmatprep.subr.bf16.mxu0 %v3429_v8 }
 0xb7e   : > { %2681 = vmatpush1.bf16.msra.mxu0 %v3427_v9 }
 0xb81   : > { %2699 = vmatmul.mubr.bf16.vlgmr.msra.gmra.mrb[20].mxu0 %v2323_v12 }
 0xc54   : > { %v2700_v21 = vpop.f32.mrb[20].mxu0 }
 0xc55   : > { %v3233_v22 = vadd.f32 %v2700_v21, %v2378_v18  ;;  %v2702_v23 = vpop.f32.mrb[21].mxu0 }
 0xc56   : > { %v3234_v25 = vadd.f32 %v2702_v23, %v2382_v19  ;;  %v2704_v26 = vpop.f32.mrb[22].mxu0 }
 0xc57   : > { %v2970_v27 = vmul.f32 -1.442695, %v3233_v22  ;;  %v2705_v28 = vpop.f32.mrb[23].mxu0 }
 0xc58   : > { %v2971_v29 = vmul.f32 -1.442695, %v3234_v25 }
 0xc59   : > { %3430 = vpow2.f32 %v2970_v27 }
 0xc5a   : > { %3432 = vpow2.f32 %v2971_v29 }
 0xc63   : > { %v3431_v32 = vpop.eup %3430 }
 0xc64   : > { %v3433_v33 = vpop.eup %3432  ;;  %v2713_v34 = vadd.f32 1.0, %v3431_v32 }
 0xc65   : > { %v2714_v36 = vadd.f32 1.0, %v3433_v33 }
 0xc67   : > { %3434 = vrcp.f32 %v2714_v36 }
 0xc68   : > { %3436 = vrcp.f32 %v2713_v34 }
 0xc71   : > { %v3435_v38 = vpop.eup %3434 }
 0xc72   : > { %v3437_v41 = vpop.eup %3436  ;;  %v2731_v42 = vsel %vm2721_vm6, %v3435_v38, %v2725_v39 }
 0xc73   : > { %v2734_v43 = vcombine.low %v3437_v41, %v2731_v42 }
 0xc75   : > { %2736 = vst [vmem:[%s575_s30] sm:$0xff] %v2734_v43 }
 0xc76 PF: > { %s28_s27 = sadd.s32 1, %s3444_s27  }
 0xc77   : > { %p25_p4 = scmp.ge.s32.totalorder %s28_s27, 4  }
 0xc79   :  { %27 = sbr.rel (!%p25_p4) target bundleno = 4 (0x4), region = 122 }

</bundles_post_ra>
